<compile_context>
chip_gen: v7x
topology: tpu7x:2x2x1
jax: 0.10.0
libtpu: 0.0.40
codegen_flags: <defaults>
</compile_context>

<pallas_src>
import functools

import jax
import jax.numpy as jnp
from jax.experimental import pallas as pl
from jax.experimental.pallas import tpu as pltpu


# ----------------------------------------------------------------------------
# Fused Pallas kernel: conv3x3 (+folded BN) + ReLU + conv1x1 for one frame
# ----------------------------------------------------------------------------
def _cell_cls_kernel(xf_ref, w1_ref, b1_ref, w2_ref, b2_ref, o_ref, *, H, W):
    """
    xf_ref : (1, (H+2)*(W+2)+2, Cin)  bf16  zero-padded frame, rows flattened
    w1_ref : (9, Cin, C1)             bf16  conv1 weights (BN scale folded in)
    b1_ref : (1, C1)                  f32   conv1 bias (BN folded)
    w2_ref : (C1, C2p)                bf16  conv2 1x1 weights, lane-padded
    b2_ref : (1, C2p)                 f32   conv2 bias, lane-padded
    o_ref  : (1, H*(W+2), C2p)        f32   output rows (incl. junk wrap cols)
    """
    C1 = w1_ref.shape[2]
    row = W + 2                       # flattened row stride of the padded frame
    M = H * row                       # output rows (junk wrap columns included)

    # --- conv1 (3x3): 9 shifted (M, Cin) @ (Cin, C1) MXU matmuls, f32 acc ----
    acc = jnp.zeros((M, C1), jnp.float32)
    for ky in range(3):
        for kx in range(3):
            s = ky * row + kx                              # static offset
            a = xf_ref[0, s:s + M, :]                      # (M, Cin) bf16
            acc = acc + jnp.dot(a, w1_ref[3 * ky + kx],
                                preferred_element_type=jnp.float32)

    # --- folded BatchNorm bias + ReLU (scale already folded into w1) --------
    y1 = jnp.maximum(acc + b1_ref[...], 0.0)               # (M, C1) f32

    # --- conv2 (1x1) -> lane-dense padded class logits -----------------------
    y2 = jnp.dot(y1.astype(jnp.bfloat16), w2_ref[...],
                 preferred_element_type=jnp.float32) + b2_ref[...]
    o_ref[0] = y2


# ----------------------------------------------------------------------------
# Wrapper: layout glue (pad / flatten / un-pad / transpose) in plain XLA
# ----------------------------------------------------------------------------
def cell_classification_forward(x_nchw, params, *, num_classes=5):
    """x_nchw: (B, 32, H, W) f32  ->  (B, num_classes, H, W) f32 (NCHW)."""
    B, Cin, H, W = x_nchw.shape
    w1, b1, w2, b2 = params["w1"], params["b1"], params["w2"], params["b2"]
    C1 = w1.shape[2]
    C2p = w2.shape[1]
    M = H * (W + 2)
    # +2 rows of zeros so the (ky=2, kx=2) tap's slice stays exactly in bounds.
    rows = (H + 2) * (W + 2) + 2

    # NCHW -> NHWC, zero-pad spatially, flatten (H+2, W+2) -> rows, cast bf16.
    x = jnp.transpose(x_nchw, (0, 2, 3, 1))
    xp = jnp.pad(x, ((0, 0), (1, 1), (1, 1), (0, 0)))
    xf = jnp.pad(xp.reshape(B, (H + 2) * (W + 2), Cin),
                 ((0, 0), (0, 2), (0, 0))).astype(jnp.bfloat16)

    cost = pl.CostEstimate(
        flops=2 * B * M * C1 * (9 * Cin + C2p),
        transcendentals=0,
        bytes_accessed=(xf.size * 2 + w1.size * 2 + w2.size * 2
                        + b1.size * 4 + b2.size * 4 + B * M * C2p * 4),
    )

    out = pl.pallas_call(
        functools.partial(_cell_cls_kernel, H=H, W=W),
        out_shape=jax.ShapeDtypeStruct((B, M, C2p), jnp.float32),
        grid=(B,),
        in_specs=[
            pl.BlockSpec((1, rows, Cin), lambda b: (b, 0, 0)),
            pl.BlockSpec((9, Cin, C1), lambda b: (0, 0, 0)),
            pl.BlockSpec((1, C1), lambda b: (0, 0)),
            pl.BlockSpec((C1, C2p), lambda b: (0, 0)),
            pl.BlockSpec((1, C2p), lambda b: (0, 0)),
        ],
        out_specs=pl.BlockSpec((1, M, C2p), lambda b: (b, 0, 0)),
        compiler_params=pltpu.CompilerParams(
            dimension_semantics=("parallel",)),
        cost_estimate=cost,
    )(xf, w1, b1, w2, b2)

    # Drop the wrap columns and the lane padding; back to PyTorch NCHW.
    out = out.reshape(B, H, W + 2, C2p)[:, :, :W, :num_classes]
    return jnp.transpose(out, (0, 3, 1, 2))


# ----------------------------------------------------------------------------
# Deterministic synthetic parameters (Conv + eval-mode BatchNorm, folded)
# ----------------------------------------------------------------------------
def init_params(key, cin=32, c1=32, num_classes=5, lane_pad=128):
    ks = jax.random.split(key, 8)
    eps = 1e-5
    w1 = jax.random.normal(ks[0], (c1, cin, 3, 3), jnp.float32) * jnp.sqrt(2.0 / (9 * cin))
    b1 = 0.01 * jax.random.normal(ks[1], (c1,), jnp.float32)
    gamma = 1.0 + 0.1 * jax.random.normal(ks[2], (c1,), jnp.float32)
    beta = 0.1 * jax.random.normal(ks[3], (c1,), jnp.float32)
    rmean = 0.1 * jax.random.normal(ks[4], (c1,), jnp.float32)
    rvar = jax.random.uniform(ks[5], (c1,), jnp.float32, 0.5, 1.5)
    w2 = jax.random.normal(ks[6], (num_classes, c1, 1, 1), jnp.float32) * jnp.sqrt(2.0 / c1)
    b2 = 0.01 * jax.random.normal(ks[7], (num_classes,), jnp.float32)

    raw = dict(w1=w1, b1=b1, gamma=gamma, beta=beta, rmean=rmean, rvar=rvar,
               eps=eps, w2=w2, b2=b2)

    # Fold eval-mode BN into conv1; scale goes into the weight columns so the
    # kernel epilogue is only bias-add + ReLU.
    scale = gamma / jnp.sqrt(rvar + eps)
    w1_f = w1 * scale[:, None, None, None]
    b1_f = beta + (b1 - rmean) * scale

    # GEMM layouts: conv1 -> (tap = 3*ky + kx, cin, c1); conv2 -> (c1, classes)
    # padded to 128 output lanes for lane-dense stores.
    w1_gemm = jnp.transpose(w1_f, (2, 3, 1, 0)).reshape(9, cin, c1)
    w2_gemm = jnp.transpose(w2[:, :, 0, 0], (1, 0))
    w2_pad = jnp.pad(w2_gemm, ((0, 0), (0, lane_pad - num_classes)))
    b2_pad = jnp.pad(b2, (0, lane_pad - num_classes))

    params = {
        "w1": w1_gemm.astype(jnp.bfloat16),
        "b1": b1_f.reshape(1, c1).astype(jnp.float32),
        "w2": w2_pad.astype(jnp.bfloat16),
        "b2": b2_pad.reshape(1, lane_pad).astype(jnp.float32),
    }
    return params, raw


# ----------------------------------------------------------------------------
# Pure-JAX f32 reference (mirrors the PyTorch module, eval-mode BN)
# ----------------------------------------------------------------------------
def reference_forward(x_nchw, raw):
    hi = jax.lax.Precision.HIGHEST
    y = jax.lax.conv_general_dilated(
        x_nchw, raw["w1"], window_strides=(1, 1), padding=((1, 1), (1, 1)),
        dimension_numbers=("NCHW", "OIHW", "NCHW"), precision=hi)
    y = y + raw["b1"][None, :, None, None]
    y = (y - raw["rmean"][None, :, None, None]) / jnp.sqrt(
        raw["rvar"][None, :, None, None] + raw["eps"])
    y = y * raw["gamma"][None, :, None, None] + raw["beta"][None, :, None, None]
    y = jnp.maximum(y, 0.0)
    y = jax.lax.conv_general_dilated(
        y, raw["w2"], window_strides=(1, 1), padding="VALID",
        dimension_numbers=("NCHW", "OIHW", "NCHW"), precision=hi)
    return y + raw["b2"][None, :, None, None]


# ----------------------------------------------------------------------------
# Main
# ----------------------------------------------------------------------------
if __name__ == "__main__":
    key = jax.random.PRNGKey(0)
    kp, kx = jax.random.split(key)

    B, C, H, W = 2, 32, 16, 16          # module requires 32 input channels
    NUM_CLASSES = 5
    x = jax.random.normal(kx, (B, C, H, W), dtype=jnp.float32)
    params, raw = init_params(kp, cin=C, c1=32, num_classes=NUM_CLASSES)

    fwd = jax.jit(functools.partial(cell_classification_forward,
                                    num_classes=NUM_CLASSES))
    out = jax.block_until_ready(fwd(x, params))

    assert out.shape == (B, NUM_CLASSES, H, W), out.shape
    assert out.dtype == jnp.float32
    assert bool(jnp.all(jnp.isfinite(out)))

    # bf16-MXU kernel vs full-f32 reference: allow bf16-level tolerance.
    ref = reference_forward(x, raw)
    max_err = float(jnp.max(jnp.abs(out - ref)))
    assert max_err < 1e-1, f"max abs error vs reference: {max_err}"

    print("KERNEL_OK")
</pallas_src>

<mosaic_0001>
module attributes {stable_mosaic.version = 11 : i64} {
  func.func @_cell_cls_kernel(%arg0: i32, %arg1: memref<1x326x32xbf16, #tpu.memory_space<vmem>>, %arg2: memref<9x32x32xbf16, #tpu.memory_space<vmem>>, %arg3: memref<1x32xf32, #tpu.memory_space<vmem>>, %arg4: memref<32x128xbf16, #tpu.memory_space<vmem>>, %arg5: memref<1x128xf32, #tpu.memory_space<vmem>>, %arg6: memref<1x288x128xf32, #tpu.memory_space<vmem>>) attributes {dimension_semantics = [#tpu.dimension_semantics<parallel>], iteration_bounds = array<i64: 2>, scalar_prefetch = 0 : i64, scratch_operands = 0 : i64, tpu.core_type = #tpu.core_type<tc>, window_params = [{transform_indices = @transform_0, window_bounds = array<i64: 1, 326, 32>}, {pipeline_mode = #tpu.pipeline_mode<synchronous>, transform_indices = @transform_1, window_bounds = array<i64: 9, 32, 32>}, {pipeline_mode = #tpu.pipeline_mode<synchronous>, transform_indices = @transform_2, window_bounds = array<i64: 1, 32>}, {pipeline_mode = #tpu.pipeline_mode<synchronous>, transform_indices = @transform_3, window_bounds = array<i64: 32, 128>}, {pipeline_mode = #tpu.pipeline_mode<synchronous>, transform_indices = @transform_4, window_bounds = array<i64: 1, 128>}, {transform_indices = @transform_5, window_bounds = array<i64: 1, 288, 128>}]} {
    %cst = arith.constant 0.000000e+00 : f32
    %0 = vector.broadcast %cst : f32 to vector<288x32xf32>
    %c0 = arith.constant 0 : index
    %c0_0 = arith.constant 0 : index
    %c0_1 = arith.constant 0 : index
    %1 = vector.load %arg1[%c0, %c0_0, %c0_1] : memref<1x326x32xbf16, #tpu.memory_space<vmem>>, vector<1x288x32xbf16>
    %2 = vector.shape_cast %1 : vector<1x288x32xbf16> to vector<288x32xbf16>
    %c0_2 = arith.constant 0 : index
    %c0_3 = arith.constant 0 : index
    %c0_4 = arith.constant 0 : index
    %3 = vector.load %arg2[%c0_2, %c0_3, %c0_4] : memref<9x32x32xbf16, #tpu.memory_space<vmem>>, vector<1x32x32xbf16>
    %4 = vector.shape_cast %3 : vector<1x32x32xbf16> to vector<32x32xbf16>
    %cst_5 = arith.constant dense<0.000000e+00> : vector<288x32xf32>
    %5 = tpu.matmul %2, %4, %cst_5 {dimension_numbers = #tpu.dot_dimension_numbers<[1], [0], [0], [1], [0, 0, 1, 1], [], []>} : vector<288x32xbf16>, vector<32x32xbf16>, vector<288x32xf32> -> vector<288x32xf32>
    %6 = arith.addf %0, %5 : vector<288x32xf32>
    %c0_6 = arith.constant 0 : index
    %c1 = arith.constant 1 : index
    %c0_7 = arith.constant 0 : index
    %7 = vector.load %arg1[%c0_6, %c1, %c0_7] : memref<1x326x32xbf16, #tpu.memory_space<vmem>>, vector<1x288x32xbf16>
    %8 = vector.shape_cast %7 : vector<1x288x32xbf16> to vector<288x32xbf16>
    %c1_8 = arith.constant 1 : index
    %c0_9 = arith.constant 0 : index
    %c0_10 = arith.constant 0 : index
    %9 = vector.load %arg2[%c1_8, %c0_9, %c0_10] : memref<9x32x32xbf16, #tpu.memory_space<vmem>>, vector<1x32x32xbf16>
    %10 = vector.shape_cast %9 : vector<1x32x32xbf16> to vector<32x32xbf16>
    %cst_11 = arith.constant dense<0.000000e+00> : vector<288x32xf32>
    %11 = tpu.matmul %8, %10, %cst_11 {dimension_numbers = #tpu.dot_dimension_numbers<[1], [0], [0], [1], [0, 0, 1, 1], [], []>} : vector<288x32xbf16>, vector<32x32xbf16>, vector<288x32xf32> -> vector<288x32xf32>
    %12 = arith.addf %6, %11 : vector<288x32xf32>
    %c0_12 = arith.constant 0 : index
    %c2 = arith.constant 2 : index
    %c0_13 = arith.constant 0 : index
    %13 = vector.load %arg1[%c0_12, %c2, %c0_13] : memref<1x326x32xbf16, #tpu.memory_space<vmem>>, vector<1x288x32xbf16>
    %14 = vector.shape_cast %13 : vector<1x288x32xbf16> to vector<288x32xbf16>
    %c2_14 = arith.constant 2 : index
    %c0_15 = arith.constant 0 : index
    %c0_16 = arith.constant 0 : index
    %15 = vector.load %arg2[%c2_14, %c0_15, %c0_16] : memref<9x32x32xbf16, #tpu.memory_space<vmem>>, vector<1x32x32xbf16>
    %16 = vector.shape_cast %15 : vector<1x32x32xbf16> to vector<32x32xbf16>
    %cst_17 = arith.constant dense<0.000000e+00> : vector<288x32xf32>
    %17 = tpu.matmul %14, %16, %cst_17 {dimension_numbers = #tpu.dot_dimension_numbers<[1], [0], [0], [1], [0, 0, 1, 1], [], []>} : vector<288x32xbf16>, vector<32x32xbf16>, vector<288x32xf32> -> vector<288x32xf32>
    %18 = arith.addf %12, %17 : vector<288x32xf32>
    %c0_18 = arith.constant 0 : index
    %c18 = arith.constant 18 : index
    %c0_19 = arith.constant 0 : index
    %19 = vector.load %arg1[%c0_18, %c18, %c0_19] : memref<1x326x32xbf16, #tpu.memory_space<vmem>>, vector<1x288x32xbf16>
    %20 = vector.shape_cast %19 : vector<1x288x32xbf16> to vector<288x32xbf16>
    %c3 = arith.constant 3 : index
    %c0_20 = arith.constant 0 : index
    %c0_21 = arith.constant 0 : index
    %21 = vector.load %arg2[%c3, %c0_20, %c0_21] : memref<9x32x32xbf16, #tpu.memory_space<vmem>>, vector<1x32x32xbf16>
    %22 = vector.shape_cast %21 : vector<1x32x32xbf16> to vector<32x32xbf16>
    %cst_22 = arith.constant dense<0.000000e+00> : vector<288x32xf32>
    %23 = tpu.matmul %20, %22, %cst_22 {dimension_numbers = #tpu.dot_dimension_numbers<[1], [0], [0], [1], [0, 0, 1, 1], [], []>} : vector<288x32xbf16>, vector<32x32xbf16>, vector<288x32xf32> -> vector<288x32xf32>
    %24 = arith.addf %18, %23 : vector<288x32xf32>
    %c0_23 = arith.constant 0 : index
    %c19 = arith.constant 19 : index
    %c0_24 = arith.constant 0 : index
    %25 = vector.load %arg1[%c0_23, %c19, %c0_24] : memref<1x326x32xbf16, #tpu.memory_space<vmem>>, vector<1x288x32xbf16>
    %26 = vector.shape_cast %25 : vector<1x288x32xbf16> to vector<288x32xbf16>
    %c4 = arith.constant 4 : index
    %c0_25 = arith.constant 0 : index
    %c0_26 = arith.constant 0 : index
    %27 = vector.load %arg2[%c4, %c0_25, %c0_26] : memref<9x32x32xbf16, #tpu.memory_space<vmem>>, vector<1x32x32xbf16>
    %28 = vector.shape_cast %27 : vector<1x32x32xbf16> to vector<32x32xbf16>
    %cst_27 = arith.constant dense<0.000000e+00> : vector<288x32xf32>
    %29 = tpu.matmul %26, %28, %cst_27 {dimension_numbers = #tpu.dot_dimension_numbers<[1], [0], [0], [1], [0, 0, 1, 1], [], []>} : vector<288x32xbf16>, vector<32x32xbf16>, vector<288x32xf32> -> vector<288x32xf32>
    %30 = arith.addf %24, %29 : vector<288x32xf32>
    %c0_28 = arith.constant 0 : index
    %c20 = arith.constant 20 : index
    %c0_29 = arith.constant 0 : index
    %31 = vector.load %arg1[%c0_28, %c20, %c0_29] : memref<1x326x32xbf16, #tpu.memory_space<vmem>>, vector<1x288x32xbf16>
    %32 = vector.shape_cast %31 : vector<1x288x32xbf16> to vector<288x32xbf16>
    %c5 = arith.constant 5 : index
    %c0_30 = arith.constant 0 : index
    %c0_31 = arith.constant 0 : index
    %33 = vector.load %arg2[%c5, %c0_30, %c0_31] : memref<9x32x32xbf16, #tpu.memory_space<vmem>>, vector<1x32x32xbf16>
    %34 = vector.shape_cast %33 : vector<1x32x32xbf16> to vector<32x32xbf16>
    %cst_32 = arith.constant dense<0.000000e+00> : vector<288x32xf32>
    %35 = tpu.matmul %32, %34, %cst_32 {dimension_numbers = #tpu.dot_dimension_numbers<[1], [0], [0], [1], [0, 0, 1, 1], [], []>} : vector<288x32xbf16>, vector<32x32xbf16>, vector<288x32xf32> -> vector<288x32xf32>
    %36 = arith.addf %30, %35 : vector<288x32xf32>
    %c0_33 = arith.constant 0 : index
    %c36 = arith.constant 36 : index
    %c0_34 = arith.constant 0 : index
    %37 = vector.load %arg1[%c0_33, %c36, %c0_34] : memref<1x326x32xbf16, #tpu.memory_space<vmem>>, vector<1x288x32xbf16>
    %38 = vector.shape_cast %37 : vector<1x288x32xbf16> to vector<288x32xbf16>
    %c6 = arith.constant 6 : index
    %c0_35 = arith.constant 0 : index
    %c0_36 = arith.constant 0 : index
    %39 = vector.load %arg2[%c6, %c0_35, %c0_36] : memref<9x32x32xbf16, #tpu.memory_space<vmem>>, vector<1x32x32xbf16>
    %40 = vector.shape_cast %39 : vector<1x32x32xbf16> to vector<32x32xbf16>
    %cst_37 = arith.constant dense<0.000000e+00> : vector<288x32xf32>
    %41 = tpu.matmul %38, %40, %cst_37 {dimension_numbers = #tpu.dot_dimension_numbers<[1], [0], [0], [1], [0, 0, 1, 1], [], []>} : vector<288x32xbf16>, vector<32x32xbf16>, vector<288x32xf32> -> vector<288x32xf32>
    %42 = arith.addf %36, %41 : vector<288x32xf32>
    %c0_38 = arith.constant 0 : index
    %c37 = arith.constant 37 : index
    %c0_39 = arith.constant 0 : index
    %43 = vector.load %arg1[%c0_38, %c37, %c0_39] : memref<1x326x32xbf16, #tpu.memory_space<vmem>>, vector<1x288x32xbf16>
    %44 = vector.shape_cast %43 : vector<1x288x32xbf16> to vector<288x32xbf16>
    %c7 = arith.constant 7 : index
    %c0_40 = arith.constant 0 : index
    %c0_41 = arith.constant 0 : index
    %45 = vector.load %arg2[%c7, %c0_40, %c0_41] : memref<9x32x32xbf16, #tpu.memory_space<vmem>>, vector<1x32x32xbf16>
    %46 = vector.shape_cast %45 : vector<1x32x32xbf16> to vector<32x32xbf16>
    %cst_42 = arith.constant dense<0.000000e+00> : vector<288x32xf32>
    %47 = tpu.matmul %44, %46, %cst_42 {dimension_numbers = #tpu.dot_dimension_numbers<[1], [0], [0], [1], [0, 0, 1, 1], [], []>} : vector<288x32xbf16>, vector<32x32xbf16>, vector<288x32xf32> -> vector<288x32xf32>
    %48 = arith.addf %42, %47 : vector<288x32xf32>
    %c0_43 = arith.constant 0 : index
    %c38 = arith.constant 38 : index
    %c0_44 = arith.constant 0 : index
    %49 = vector.load %arg1[%c0_43, %c38, %c0_44] : memref<1x326x32xbf16, #tpu.memory_space<vmem>>, vector<1x288x32xbf16>
    %50 = vector.shape_cast %49 : vector<1x288x32xbf16> to vector<288x32xbf16>
    %c8 = arith.constant 8 : index
    %c0_45 = arith.constant 0 : index
    %c0_46 = arith.constant 0 : index
    %51 = vector.load %arg2[%c8, %c0_45, %c0_46] : memref<9x32x32xbf16, #tpu.memory_space<vmem>>, vector<1x32x32xbf16>
    %52 = vector.shape_cast %51 : vector<1x32x32xbf16> to vector<32x32xbf16>
    %cst_47 = arith.constant dense<0.000000e+00> : vector<288x32xf32>
    %53 = tpu.matmul %50, %52, %cst_47 {dimension_numbers = #tpu.dot_dimension_numbers<[1], [0], [0], [1], [0, 0, 1, 1], [], []>} : vector<288x32xbf16>, vector<32x32xbf16>, vector<288x32xf32> -> vector<288x32xf32>
    %54 = arith.addf %48, %53 : vector<288x32xf32>
    %c0_48 = arith.constant 0 : index
    %c0_49 = arith.constant 0 : index
    %55 = vector.load %arg3[%c0_48, %c0_49] : memref<1x32xf32, #tpu.memory_space<vmem>>, vector<1x32xf32>
    %56 = vector.broadcast %55 : vector<1x32xf32> to vector<288x32xf32>
    %57 = arith.addf %54, %56 : vector<288x32xf32>
    %cst_50 = arith.constant 0.000000e+00 : f32
    %58 = vector.broadcast %cst_50 : f32 to vector<288x32xf32>
    %59 = arith.maximumf %57, %58 : vector<288x32xf32>
    %60 = arith.truncf %59 : vector<288x32xf32> to vector<288x32xbf16>
    %c0_51 = arith.constant 0 : index
    %c0_52 = arith.constant 0 : index
    %61 = vector.load %arg4[%c0_51, %c0_52] : memref<32x128xbf16, #tpu.memory_space<vmem>>, vector<32x128xbf16>
    %cst_53 = arith.constant dense<0.000000e+00> : vector<288x128xf32>
    %62 = tpu.matmul %60, %61, %cst_53 {dimension_numbers = #tpu.dot_dimension_numbers<[1], [0], [0], [1], [0, 0, 1, 1], [], []>} : vector<288x32xbf16>, vector<32x128xbf16>, vector<288x128xf32> -> vector<288x128xf32>
    %c0_54 = arith.constant 0 : index
    %c0_55 = arith.constant 0 : index
    %63 = vector.load %arg5[%c0_54, %c0_55] : memref<1x128xf32, #tpu.memory_space<vmem>>, vector<1x128xf32>
    %64 = vector.broadcast %63 : vector<1x128xf32> to vector<288x128xf32>
    %65 = arith.addf %62, %64 : vector<288x128xf32>
    %c0_56 = arith.constant 0 : index
    %c0_57 = arith.constant 0 : index
    %c0_58 = arith.constant 0 : index
    %66 = vector.load %arg6[%c0_56, %c0_57, %c0_58] : memref<1x288x128xf32, #tpu.memory_space<vmem>>, vector<1x288x128xf32>
    %67 = vector.shape_cast %66 : vector<1x288x128xf32> to vector<288x128xf32>
    %68 = vector.shape_cast %65 : vector<288x128xf32> to vector<1x288x128xf32>
    tpu.vector_store %arg6[%c0_56, %c0_57, %c0_58], %68 {strides = array<i32>} : memref<1x288x128xf32, #tpu.memory_space<vmem>>, vector<1x288x128xf32>,
    return
  }
  func.func @transform_0(%arg0: i32) -> (i32, i32, i32) {
    %c0_i32 = arith.constant 0 : i32
    %c0_i32_0 = arith.constant 0 : i32
    %c0_i32_1 = arith.constant 0 : i32
    return %arg0, %c0_i32, %c0_i32_0 : i32, i32, i32
  }
  func.func @transform_1(%arg0: i32) -> (i32, i32, i32) {
    %c0_i32 = arith.constant 0 : i32
    %c0_i32_0 = arith.constant 0 : i32
    %c0_i32_1 = arith.constant 0 : i32
    %c0_i32_2 = arith.constant 0 : i32
    return %c0_i32, %c0_i32_0, %c0_i32_1 : i32, i32, i32
  }
  func.func @transform_2(%arg0: i32) -> (i32, i32) {
    %c0_i32 = arith.constant 0 : i32
    %c0_i32_0 = arith.constant 0 : i32
    %c0_i32_1 = arith.constant 0 : i32
    return %c0_i32, %c0_i32_0 : i32, i32
  }
  func.func @transform_3(%arg0: i32) -> (i32, i32) {
    %c0_i32 = arith.constant 0 : i32
    %c0_i32_0 = arith.constant 0 : i32
    %c0_i32_1 = arith.constant 0 : i32
    return %c0_i32, %c0_i32_0 : i32, i32
  }
  func.func @transform_4(%arg0: i32) -> (i32, i32) {
    %c0_i32 = arith.constant 0 : i32
    %c0_i32_0 = arith.constant 0 : i32
    %c0_i32_1 = arith.constant 0 : i32
    return %c0_i32, %c0_i32_0 : i32, i32
  }
  func.func @transform_5(%arg0: i32) -> (i32, i32, i32) {
    %c0_i32 = arith.constant 0 : i32
    %c0_i32_0 = arith.constant 0 : i32
    %c0_i32_1 = arith.constant 0 : i32
    return %arg0, %c0_i32, %c0_i32_0 : i32, i32, i32
  }
}

</mosaic_0001>

<bundles_post_ra>
// kernel: cell_classification_forward.1
= control target key start
LH: loop header
LB: loop body
LE: loop exit
PB: predicated region body
PF: predicated region fallthrough
CT: control target
= control target key end

     0   :  { %s5566_s18 = smov 0   ;;  %s6612_s0 = inlined_call_operand.vmem [shape: bf16[2,326,32], index: 0, kind: input, shape index: {}]   ;;  %s6613_s1 = inlined_call_operand.vmem [shape: bf16[9,32,32], index: 1, kind: input, shape index: {}]   ;;  %s6614_s2 = inlined_call_operand.vmem [shape: f32[1,32], index: 2, kind: input, shape index: {}]   ;;  %s6615_s3 = inlined_call_operand.vmem [shape: bf16[32,128], index: 3, kind: input, shape index: {}]   ;;  %s6616_s4 = inlined_call_operand.vmem [shape: f32[1,128], index: 4, kind: input, shape index: {}]   ;;  %s6617_s5 = inlined_call_operand.vmem [shape: f32[2,288,128], index: 5, kind: output, shape index: {}]  }
   0x1 LB: > { %s4223_s19 = sadd.s32 4294967295, %s5534_s18   ;;  %p4227_p0 = scmp.ge.s32.totalorder %s5534_s18, 1  ;;  %s5534_s18 = sphi %s5566_s18, %s15_s18  }
   0x2   : > { %p187_p1 = scmp.lt.s32.totalorder %s5534_s18, 3 }
   0x4   : > { %p188_p2 = pnand %p4227_p0, %p187_p1 }
   0x6   : > { %191 = sbr.rel (%p188_p2) target bundleno = 827 (0x33b), region = 40 }
   0xd   : > { %v5426_v0 = vld [vmem:[%s6613_s1 + $0x40] sm:$0xff]   ;;  %p215_p3 = scmp.lt.s32.totalorder %s4223_s19, 1  ;;  %v5427_v1 = vld [vmem:[%s6613_s1 + $0x10] sm:$0xff]   ;;  %v5428_v2 = vld [vmem:[%s6613_s1 + $0x48] sm:$0xff]   ;;  %vm365_vm0 = vsmask.f32 7424 }
   0xe   : > { %4888 = vmatprep.subr.bf16.mxu0 %v5426_v0  ;;  %4728 = vmatprep.subr.bf16.mxu1 %v5427_v1  ;;  %v5429_v3 = vld [vmem:[%s6613_s1 + $0x18] sm:$0xff]   ;;  %v5592_v4 = vld [vmem:[%s6613_s1 + $0x50] sm:$0xff]   ;;  %vm526_vm1 = vcmask 261120   ;;  %vm1769_vm2 = vsmask.f32 6400  ;;  %vm2228_vm3 = vcmask 1045504  }
   0xf   : > { %s6626_s19 = smov (!%p215_p3, %s4223_s19), 1  ;;  %4889 = vmatpush3.bf16.msra.mxu0 %v5426_v0  ;;  %4729 = vmatpush3.bf16.msra.mxu1 %v5427_v1  ;;  %v5453_v56 = vld [vmem:[%s6613_s1 + $0x58] sm:$0xff]   ;;  %vm992_vm4 = vcmask 1046528   ;;  %vm3005_vm5 = vsmask.f32 5376  ;;  %vm3464_vm6 = vcmask 1044480  }
  0x10   : > { %4890 = vmatprep.subr.bf16.mxu0 %v5428_v2  ;;  %s5416_s28 = smul.u32 164, %s6626_s19  ;;  %4730 = vmatprep.subr.bf16.mxu1 %v5429_v3 }
  0x11   : > { %s5417_s20 = smul.u32 288, %s6626_s19 }
  0x12   : > { %s5597_s8 = scalar_lea.vmem %s6612_s0, %s5416_s28 }
  0x13   : > { %4891 = vmatpush3.bf16.msra.mxu0 %v5428_v2  ;;  %v226_v5 = vld [vmem:[%s5597_s8] sm:$0xf]  ;;  %v227_v6 = vld [vmem:[%s5597_s8 + $0x4] sm:$0xf]  ;;  %4731 = vmatpush3.bf16.msra.mxu1 %v5429_v3  ;;  %v5604_v8 = vld [vmem:[%s5597_s8 + $0x8] sm:$0xff]   ;;  %s6535_s25 = scalar_lea.vmem %s6617_s5, %s5417_s20 }
  0x14   : > { %v5601_v7 = vcombine.low %v226_v5, %v227_v6  ;;  %v1309_v9 = vld [vmem:[%s5597_s8 + $0x8] sm:$0xe]  ;;  %4928 = vmatprep.subr.bf16.mxu0 %v5592_v4  ;;  %v5609_v10 = vld [vmem:[%s5597_s8 + $0xc] sm:$0xf]  ;;  %v374_v13 = vshll.u32 %v5604_v8, 16  ;;  %v378_v14 = vshrl.u32 %v5604_v8, 16 }
  0x15   : > { %v5616_v15 = vld [vmem:[%s5597_s8 + $0x10] sm:$0xff]   ;;  %v5622_v17 = vcombine.low %v1309_v9, %v5609_v10  ;;  %v5630_v25 = vld [vmem:[%s5597_s8 + $0x18] sm:$0xff]   ;;  %v5636_v31 = vld [vmem:[%s5597_s8 + $0x20] sm:$0xff]  }
  0x16   : > { %v367_v11 = vshrl.u32 %v5601_v7, 16  ;;  %v369_v12 = vshll.u32 %v5601_v7, 16  ;;  %v5619_v16 = vld [vmem:[%s5597_s8 + $0x10] sm:$0xff]   ;;  %v376_v19 = vrot.slane %v374_v13, 1  ;;  %v1779_v20 = vshrl.u32 %v5616_v15, 16  ;;  %v5633_v30 = vld [vmem:[%s5597_s8 + $0x18] sm:$0xff]  }
  0x17   : > { %6621 = vst [vmem:[#allocation2_spill] sm:$0xff] %v5622_v17  ;;  %v1782_v21 = vshll.u32 %v5616_v15, 16  ;;  %v1771_v22 = vshrl.u32 %v5622_v17, 16  ;;  %v1774_v23 = vshll.u32 %v5622_v17, 16  ;;  %v382_v24 = vshll.u32 %v5619_v16, 16  ;;  %v5646_v44 = vld [vmem:[%s5597_s8 + $0x20] sm:$0xff]  }
  0x18   : > { %v371_v18 = vrot.slane %v369_v12, 1  ;;  %v380_v27 = vor.u32 %v378_v14, %v376_v19  ;;  %v1781_v28 = vrot.slane %v1779_v20, 1  ;;  %v1788_v35 = vshrl.u32 %v5630_v25, 16  ;;  %v5649_v45 = vld [vmem:[%s5597_s8 + $0x28] sm:$0xff]   ;;  %v5661_v55 = vld [vmem:[%s5597_s8 + $0x30] sm:$0xff]   ;;  %v5681_v14 = vld [vmem:[%s5597_s8 + $0x38] sm:$0xff]  }
  0x19   : > { %v1784_v29 = vrot.slane %v1782_v21, 2  ;;  %v1773_v32 = vrot.slane %v1771_v22, 1  ;;  %v1776_v33 = vrot.slane %v1774_v23, 2  ;;  %v384_v34 = vrot.slane %v382_v24, 1  ;;  %v5655_v50 = vld [vmem:[%s5597_s8 + $0x28] sm:$0xff]   ;;  %v5669_v61 = vld [vmem:[%s5597_s8 + $0x30] sm:$0xff]  }
  0x1a   : > { %v372_v26 = vor.u32 %v371_v18, %v367_v11  ;;  %v1791_v38 = vshll.u32 %v5630_v25, 16  ;;  %v386_v39 = vshrl.u32 %v5619_v16, 16  ;;  %v1790_v42 = vrot.slane %v1788_v35, 1 }
  0x1b   : > { %v1785_v37 = vor.u32 %v1784_v29, %v1781_v28  ;;  %v1777_v40 = vor.u32 %v1776_v33, %v1773_v32  ;;  %v385_v41 = vsel %vm365_vm0, %v380_v27, %v384_v34  ;;  %v390_v43 = vshll.u32 %v5633_v30, 16  ;;  %v5690_v27 = vld [vmem:[%s5597_s8 + $0x38] sm:$0xff]  }
  0x1c   : > { %v377_v36 = vsel %vm365_vm0, %v372_v26, %v376_v19  ;;  %v1793_v46 = vrot.slane %v1791_v38, 2  ;;  %v388_v47 = vor.u32 %v386_v39, %v384_v34  ;;  %v1797_v48 = vshrl.u32 %v5636_v31, 16 }
  0x1d   : > { %4732 = vmatprep.mubr.msk.bf16.mxu1 %vm526_vm1, %v377_v36  ;;  %v1800_v49 = vshll.u32 %v5636_v31, 16  ;;  %v1786_v51 = vsel %vm1769_vm2, %v1777_v40, %v1785_v37  ;;  %v392_v52 = vrot.slane %v390_v43, 1  ;;  %v394_v53 = vshrl.u32 %v5633_v30, 16 }
  0x1e   : > { %4733 = vmatmul.mubr.msk.bf16.vlgmr.msra.gmra.mrb[0].mxu1 %vm526_vm1, %v385_v41  ;;  %v398_v54 = vshll.u32 %v5646_v44, 16  ;;  %4892 = vmatprep.mubr.msk.bf16.mxu0 %vm526_vm1, %v1786_v51  ;;  %v1794_v57 = vor.u32 %v1793_v46, %v1790_v42  ;;  %v1799_v58 = vrot.slane %v1797_v48, 1  ;;  %v1806_v60 = vshrl.u32 %v5649_v45, 16  ;;  %v5704_v42 = vld [vmem:[%s5597_s8 + $0x40] sm:$0xff]  }
  0x1f   : > { %v1802_v59 = vrot.slane %v1800_v49, 2  ;;  %v393_v62 = vsel %vm365_vm0, %v388_v47, %v392_v52  ;;  %v396_v63 = vor.u32 %v394_v53, %v392_v52  ;;  %v1809_v1 = vshll.u32 %v5649_v45, 16 }
  0x20   : > { %v400_v0 = vrot.slane %v398_v54, 1  ;;  %v1795_v2 = vsel %vm1769_vm2, %v1785_v37, %v1794_v57  ;;  %4736 = vmatprep.mubr.msk.bf16.mxu1 %vm526_vm1, %v393_v62  ;;  %v1808_v5 = vrot.slane %v1806_v60, 1  ;;  %v402_v6 = vshrl.u32 %v5646_v44, 16  ;;  %v5699_v37 = vld [vmem:[%s5597_s8 + $0x40] sm:$0xff]   ;;  %v5712_v54 = vld [vmem:[%s5597_s8 + $0x48] sm:$0xff]  }
  0x21   : > { %v1803_v3 = vor.u32 %v1802_v59, %v1799_v58  ;;  %4893 = vmatmul.mubr.msk.bf16.vlgmr.msra.gmra.mrb[0].mxu0 %vm526_vm1, %v1795_v2  ;;  %v1811_v11 = vrot.slane %v1809_v1, 2  ;;  %v406_v12 = vshll.u32 %v5655_v50, 16  ;;  %v1815_v13 = vshrl.u32 %v5661_v55, 16 }
  0x22   : > { %v401_v9 = vsel %vm365_vm0, %v396_v63, %v400_v0  ;;  %4929 = vmatpush3.bf16.msra.mxu0 %v5592_v4  ;;  %v404_v19 = vor.u32 %v402_v6, %v400_v0  ;;  %v1818_v20 = vshll.u32 %v5661_v55, 16  ;;  %v410_v21 = vshrl.u32 %v5655_v50, 16  ;;  %v5724_v0 = vld [vmem:[%s5597_s8 + $0x50] sm:$0xff]  }
  0x23   : > { %v1804_v18 = vsel %vm1769_vm2, %v1794_v57, %v1803_v3  ;;  %v1812_v22 = vor.u32 %v1811_v11, %v1808_v5  ;;  %v408_v23 = vrot.slane %v406_v12, 1  ;;  %v1817_v24 = vrot.slane %v1815_v13, 1  ;;  %4930 = vmatprep.subr.bf16.mxu0 %v5453_v56  ;;  %v5715_v57 = vld [vmem:[%s5597_s8 + $0x48] sm:$0xff]   ;;  %v5732_v11 = vld [vmem:[%s5597_s8 + $0x50] sm:$0xff]  }
  0x24   : > { %4896 = vmatprep.mubr.msk.bf16.mxu0 %vm526_vm1, %v1804_v18  ;;  %v414_v26 = vshll.u32 %v5669_v61, 16  ;;  %v1820_v4 = vrot.slane %v1818_v20, 2  ;;  %v1824_v28 = vshrl.u32 %v5681_v14, 16  ;;  %v1827_v29 = vshll.u32 %v5681_v14, 16  ;;  %v5737_v18 = vld [vmem:[%s5597_s8 + $0x58] sm:$0xff]  }
  0x25   : > { %v418_v32 = vshrl.u32 %v5669_v61, 16  ;;  %v1813_v33 = vsel %vm1769_vm2, %v1803_v3, %v1812_v22  ;;  %v409_v34 = vsel %vm365_vm0, %v404_v19, %v408_v23  ;;  %v412_v35 = vor.u32 %v410_v21, %v408_v23 }
  0x26   : > { %4737 = vmatmul.mubr.msk.bf16.gmra.mrb[4].mxu1 %vm526_vm1, %v401_v9  ;;  %v416_v36 = vrot.slane %v414_v26, 1  ;;  %v1821_v38 = vor.u32 %v1820_v4, %v1817_v24  ;;  %v1826_v39 = vrot.slane %v1824_v28, 1  ;;  %v1829_v40 = vrot.slane %v1827_v29, 2  ;;  %4931 = vmatpush3.bf16.msra.mxu0 %v5453_v56  ;;  %v5742_v28 = vld [vmem:[%s5597_s8 + $0x58] sm:$0xff]  }
  0x27   : > { %4740 = vmatprep.mubr.msk.bf16.mxu1 %vm526_vm1, %v409_v34  ;;  %v422_v41 = vshll.u32 %v5690_v27, 16  ;;  %v1833_v47 = vshrl.u32 %v5699_v37, 16  ;;  %v1836_v48 = vshll.u32 %v5699_v37, 16  ;;  %v426_v53 = vshrl.u32 %v5690_v27, 16 }
  0x28   : > { %v417_v43 = vsel %vm365_vm0, %v412_v35, %v416_v36  ;;  %v420_v46 = vor.u32 %v418_v32, %v416_v36  ;;  %v1822_v49 = vsel %vm1769_vm2, %v1812_v22, %v1821_v38  ;;  %v1830_v51 = vor.u32 %v1829_v40, %v1826_v39  ;;  %v5750_v35 = vld [vmem:[%s5597_s8 + $0x60] sm:$0xff]  }
  0x29   : > { %v424_v52 = vrot.slane %v422_v41, 1  ;;  %4897 = vmatmul.mubr.msk.bf16.gmra.mrb[4].mxu0 %vm526_vm1, %v1813_v33  ;;  %v1835_v56 = vrot.slane %v1833_v47, 1  ;;  %v1838_v58 = vrot.slane %v1836_v48, 2  ;;  %v430_v59 = vshll.u32 %v5704_v42, 16  ;;  %v5760_v48 = vld [vmem:[%s5597_s8 + $0x60] sm:$0xff]  }
  0x2a   : > { %v434_v60 = vshrl.u32 %v5704_v42, 16  ;;  %4900 = vmatprep.mubr.msk.bf16.mxu0 %vm526_vm1, %v1822_v49  ;;  %v1842_v63 = vshrl.u32 %v5712_v54, 16  ;;  %v1845_v2 = vshll.u32 %v5712_v54, 16  ;;  %v438_v3 = vshll.u32 %v5715_v57, 16  ;;  %v5763_v49 = vld [vmem:[%s5597_s8 + $0x68] sm:$0xff]  }
  0x2b   : > { %v425_v62 = vsel %vm365_vm0, %v420_v46, %v424_v52  ;;  %v1839_v1 = vor.u32 %v1838_v58, %v1835_v56  ;;  %v432_v5 = vrot.slane %v430_v59, 1  ;;  %v1851_v6 = vshrl.u32 %v5724_v0, 16 }
  0x2c   : > { %v1854_v9 = vshll.u32 %v5724_v0, 16  ;;  %v1831_v12 = vsel %vm1769_vm2, %v1821_v38, %v1830_v51  ;;  %v428_v13 = vor.u32 %v426_v53, %v424_v52  ;;  %v1844_v19 = vrot.slane %v1842_v63, 1 }
  0x2d   : > { %v1847_v20 = vrot.slane %v1845_v2, 2  ;;  %v436_v21 = vor.u32 %v434_v60, %v432_v5  ;;  %v440_v22 = vrot.slane %v438_v3, 1  ;;  %v1840_v23 = vsel %vm1769_vm2, %v1830_v51, %v1839_v1  ;;  %v5768_v60 = vld [vmem:[%s5597_s8 + $0x68] sm:$0xff]   ;;  %v5772_v3 = vld [vmem:[%s5597_s8 + $0x70] sm:$0xff]  }
  0x2e   : > { %4741 = vmatmul.mubr.msk.bf16.gmra.mrb[8].mxu1 %vm526_vm1, %v417_v43  ;;  %v1853_v24 = vrot.slane %v1851_v6, 1  ;;  %v1856_v26 = vrot.slane %v1854_v9, 2  ;;  %v446_v4 = vshll.u32 %v5732_v11, 16  ;;  %v433_v29 = vsel %vm365_vm0, %v428_v13, %v432_v5 }
  0x2f   : > { %4744 = vmatprep.mubr.msk.bf16.mxu1 %vm526_vm1, %v425_v62  ;;  %v442_v32 = vshrl.u32 %v5715_v57, 16  ;;  %v1860_v33 = vshrl.u32 %v5737_v18, 16  ;;  %v1863_v34 = vshll.u32 %v5737_v18, 16  ;;  %v1848_v36 = vor.u32 %v1847_v20, %v1844_v19 }
  0x30   : > { %v441_v38 = vsel %vm365_vm0, %v436_v21, %v440_v22  ;;  %v450_v39 = vshrl.u32 %v5732_v11, 16  ;;  %v454_v40 = vshll.u32 %v5742_v28, 16  ;;  %v1857_v41 = vor.u32 %v1856_v26, %v1853_v24 }
  0x31   : > { %4901 = vmatmul.mubr.msk.bf16.gmra.mrb[8].mxu0 %vm526_vm1, %v1831_v12  ;;  %v1869_v43 = vshrl.u32 %v5750_v35, 16  ;;  %v1872_v46 = vshll.u32 %v5750_v35, 16  ;;  %v448_v47 = vrot.slane %v446_v4, 1  ;;  %v444_v51 = vor.u32 %v442_v32, %v440_v22 }
  0x32   : > { %4904 = vmatprep.mubr.msk.bf16.mxu0 %vm526_vm1, %v1840_v23  ;;  %v1862_v52 = vrot.slane %v1860_v33, 1  ;;  %v1865_v53 = vrot.slane %v1863_v34, 2  ;;  %v1849_v56 = vsel %vm1769_vm2, %v1839_v1, %v1848_v36  ;;  %v456_v59 = vrot.slane %v454_v40, 1  ;;  %v5792_v34 = vld [vmem:[%s5597_s8 + $0x78] sm:$0xff]  }
  0x33   : > { %v452_v58 = vor.u32 %v450_v39, %v448_v47  ;;  %v1858_v62 = vsel %vm1769_vm2, %v1848_v36, %v1857_v41  ;;  %v1871_v63 = vrot.slane %v1869_v43, 1  ;;  %v1874_v2 = vrot.slane %v1872_v46, 2  ;;  %v5796_v40 = vld [vmem:[%s5597_s8 + $0x78] sm:$0xff]  }
  0x34   : > { %v462_v5 = vshll.u32 %v5760_v48, 16  ;;  %v1878_v6 = vshrl.u32 %v5763_v49, 16  ;;  %v449_v9 = vsel %vm365_vm0, %v444_v51, %v448_v47  ;;  %v458_v1 = vshrl.u32 %v5742_v28, 16  ;;  %v5800_v51 = vld [vmem:[%s5597_s8 + $0x80] sm:$0xff]  }
  0x35   : > { %v1881_v12 = vshll.u32 %v5763_v49, 16  ;;  %v1866_v13 = vor.u32 %v1865_v53, %v1862_v52  ;;  %v457_v19 = vsel %vm365_vm0, %v452_v58, %v456_v59  ;;  %v466_v20 = vshrl.u32 %v5760_v48, 16 }
  0x36   : > { %4745 = vmatmul.mubr.msk.bf16.gmra.mrb[12].mxu1 %vm526_vm1, %v433_v29  ;;  %v470_v21 = vshll.u32 %v5768_v60, 16  ;;  %v1875_v22 = vor.u32 %v1874_v2, %v1871_v63  ;;  %v1887_v23 = vshrl.u32 %v5772_v3, 16  ;;  %v1890_v24 = vshll.u32 %v5772_v3, 16  ;;  %v5788_v29 = vld [vmem:[%s5597_s8 + $0x70] sm:$0xff]  }
  0x37   : > { %4748 = vmatprep.mubr.msk.bf16.mxu1 %vm526_vm1, %v441_v38  ;;  %v464_v26 = vrot.slane %v462_v5, 1  ;;  %v1880_v4 = vrot.slane %v1878_v6, 1  ;;  %v460_v32 = vor.u32 %v458_v1, %v456_v59  ;;  %v1883_v33 = vrot.slane %v1881_v12, 2  ;;  %v5469_v59 = vld [vmem:[%s6613_s1] sm:$0xff]  }
  0x38   : > { %v1867_v36 = vsel %vm1769_vm2, %v1857_v41, %v1866_v13  ;;  %v472_v39 = vrot.slane %v470_v21, 1  ;;  %v1876_v43 = vsel %vm1769_vm2, %v1866_v13, %v1875_v22  ;;  %v1889_v46 = vrot.slane %v1887_v23, 1  ;;  %4768 = vmatprep.subr.bf16.mxu1 %v5469_v59  ;;  %v5823_v23 = vld [vmem:[%s5597_s8 + $0x88] sm:$0xff]  }
  0x39   : > { %4905 = vmatmul.mubr.msk.bf16.gmra.mrb[12].mxu0 %vm526_vm1, %v1849_v56  ;;  %v468_v38 = vor.u32 %v466_v20, %v464_v26  ;;  %v1892_v47 = vrot.slane %v1890_v24, 2  ;;  %v474_v52 = vshrl.u32 %v5768_v60, 16  ;;  %v478_v53 = vshll.u32 %v5788_v29, 16  ;;  %v5826_v24 = vld [vmem:[%s5597_s8 + $0x88] sm:$0xff]   ;;  %4769 = vmatpush3.bf16.msra.mxu1 %v5469_v59  ;;  %v5851_v59 = vld [vmem:[%s6613_s1 + $0x20] sm:$0xff]  }
  0x3a   : > { %4908 = vmatprep.mubr.msk.bf16.mxu0 %vm526_vm1, %v1858_v62  ;;  %v465_v56 = vsel %vm365_vm0, %v460_v32, %v464_v26  ;;  %v1896_v41 = vshrl.u32 %v5792_v34, 16  ;;  %v1899_v58 = vshll.u32 %v5792_v34, 16  ;;  %v1884_v62 = vor.u32 %v1883_v33, %v1880_v4  ;;  %v5471_v33 = vld [vmem:[%s6613_s1 + $0x8] sm:$0xff]  }
  0x3b   : > { %v473_v63 = vsel %vm365_vm0, %v468_v38, %v472_v39  ;;  %v482_v2 = vshrl.u32 %v5788_v29, 16  ;;  %v486_v5 = vshll.u32 %v5796_v40, 16  ;;  %v1893_v6 = vor.u32 %v1892_v47, %v1889_v46  ;;  %4770 = vmatprep.subr.bf16.mxu1 %v5471_v33 }
  0x3c   : > { %v1908_v1 = vshll.u32 %v5800_v51, 16  ;;  %v476_v12 = vor.u32 %v474_v52, %v472_v39  ;;  %v480_v13 = vrot.slane %v478_v53, 1  ;;  %v1898_v20 = vrot.slane %v1896_v41, 1 }
  0x3d   : > { %v1901_v21 = vrot.slane %v1899_v58, 2  ;;  %v1885_v26 = vsel %vm1769_vm2, %v1875_v22, %v1884_v62  ;;  %v488_v32 = vrot.slane %v486_v5, 1  ;;  %v490_v47 = vshrl.u32 %v5796_v40, 16  ;;  %v5842_v22 = vld [vmem:[%s6613_s1 + $0x60] sm:$0xff]   ;;  %4771 = vmatpush3.bf16.msra.mxu1 %v5471_v33 }
  0x3e   : > { %4749 = vmatmul.mubr.msk.bf16.gmra.mrb[16].mxu1 %vm526_vm1, %v449_v9  ;;  %v1905_v9 = vshrl.u32 %v5800_v51, 16  ;;  %v484_v4 = vor.u32 %v482_v2, %v480_v13  ;;  %v1910_v39 = vrot.slane %v1908_v1, 2  ;;  %v481_v46 = vsel %vm365_vm0, %v476_v12, %v480_v13  ;;  %v5857_v2 = vld [vmem:[%s5597_s8 + $0x90] ss:$0 sps:$4 sm:$0x11]   ;;  %4968 = vmatprep.subr.bf16.mxu0 %v5842_v22 }
  0x3f   : > { %4752 = vmatprep.mubr.msk.bf16.mxu1 %vm526_vm1, %v457_v19  ;;  %v5819_v19 = vld [vmem:[%s5597_s8 + $0x80] sm:$0xff]   ;;  %v1902_v53 = vor.u32 %v1901_v21, %v1898_v20  ;;  %v1917_v41 = vshll.u32 %v5823_v23, 16  ;;  %4808 = vmatprep.subr.bf16.mxu1 %v5851_v59  ;;  %v492_v20 = vor.u32 %v490_v47, %v488_v32  ;;  %v5470_v21 = vld [vmem:[%s5597_s8 + $0x98] ss:$0 sps:$4 sm:$0x33]  }
  0x40   : > { %6622 = vst [vmem:[#allocation3_spill] sm:$0xff] %v5819_v19  ;;  %v1907_v38 = vrot.slane %v1905_v9, 1  ;;  %v494_v52 = vshll.u32 %v5819_v19, 16  ;;  %v498_v58 = vshrl.u32 %v5819_v19, 16  ;;  %v506_v19 = vshrl.u32 %v5826_v24, 16 }
  0x41   : > { %4909 = vmatmul.mubr.msk.bf16.gmra.mrb[16].mxu0 %vm526_vm1, %v1867_v36  ;;  %v1894_v36 = vsel %vm1769_vm2, %v1884_v62, %v1893_v6  ;;  %v489_v62 = vsel %vm365_vm0, %v484_v4, %v488_v32  ;;  %v1903_v13 = vsel %vm1769_vm2, %v1893_v6, %v1902_v53  ;;  %v1919_v4 = vrot.slane %v1917_v41, 2 }
  0x42   : > { %4912 = vmatprep.mubr.msk.bf16.mxu0 %vm526_vm1, %v1876_v43  ;;  %v5834_v43 = vld [vmem:[%s5597_s8 + $0x90] sm:$0xff]   ;;  %v1911_v5 = vor.u32 %v1910_v39, %v1907_v38  ;;  %v496_v12 = vrot.slane %v494_v52, 1  ;;  %v1932_v32 = vshrl.u32 %v5470_v21, 16  ;;  %v1935_v47 = vshll.u32 %v5470_v21, 16 }
  0x43   : > { %v1923_v9 = vshrl.u32 %v5834_v43, 16  ;;  %v1926_v1 = vshll.u32 %v5834_v43, 16  ;;  %v2264_v41 = vrot.slane %v5470_v21, 2 }
  0x44   : > { %v500_v33 = vor.u32 %v498_v58, %v496_v12  ;;  %v1912_v38 = vsel %vm1769_vm2, %v1902_v53, %v1911_v5  ;;  %v497_v6 = vsel %vm365_vm0, %v492_v20, %v496_v12  ;;  %v2262_v53 = vrot.slane %v5834_v43, 2  ;;  %v5510_v43 = vld [vmem:[%s5597_s8 + $0x10] sm:$0xff]  }
  0x45   : > { %v1925_v39 = vrot.slane %v1923_v9, 1  ;;  %v1928_v17 = vrot.slane %v1926_v1, 2  ;;  %v1937_v20 = vrot.slane %v1935_v47, 2  ;;  %v2244_v47 = vrot.slane %v5712_v54, 2 }
  0x46   : > { %4753 = vmatmul.mubr.msk.bf16.gmra.mrb[20].mxu1 %vm526_vm1, %v465_v56  ;;  %v1914_v56 = vshrl.u32 %v5823_v23, 16  ;;  %v2250_v54 = vrot.slane %v5750_v35, 2 }
  0x47   : > { %4756 = vmatprep.mubr.msk.bf16.mxu1 %vm526_vm1, %v473_v63  ;;  %v502_v63 = vshll.u32 %v5826_v24, 16  ;;  %v1929_v58 = vor.u32 %v1928_v17, %v1925_v39 }
  0x49   : > { %4913 = vmatmul.mubr.msk.bf16.gmra.mrb[20].mxu0 %vm526_vm1, %v1885_v26  ;;  %v1916_v26 = vrot.slane %v1914_v56, 1 }
  0x4a   : > { %4916 = vmatprep.mubr.msk.bf16.mxu0 %vm526_vm1, %v1894_v36  ;;  %v504_v36 = vrot.slane %v502_v63, 1  ;;  %v5880_v63 = vsel %vm2228_vm3, %v2262_v53, %v2264_v41 }
  0x4b   : > { %v1920_v52 = vor.u32 %v1919_v4, %v1916_v26 }
  0x4c   : > { %v505_v56 = vsel %vm365_vm0, %v500_v33, %v504_v36  ;;  %v508_v9 = vor.u32 %v506_v19, %v504_v36  ;;  %v5476_v36 = vld [vmem:[%s6613_s1 + $0x28] sm:$0xff]  }
  0x4d   : > { %v1921_v12 = vsel %vm1769_vm2, %v1911_v5, %v1920_v52  ;;  %v1930_v17 = vsel %vm1769_vm2, %v1920_v52, %v1929_v58  ;;  %v2232_v5 = vrot.slane %v5630_v25, 2  ;;  %v5474_v25 = vld [vmem:[%s6613_s1 + $0x68] sm:$0xff]  }
  0x4e   : > { %4757 = vmatmul.mubr.msk.bf16.gmra.mrb[24].mxu1 %vm526_vm1, %v481_v46  ;;  %v510_v46 = vshll.u32 %v5857_v2, 16 }
  0x4f   : > { %4760 = vmatprep.mubr.msk.bf16.mxu1 %vm526_vm1, %v489_v62  ;;  %v2219_v62 = vld [vmem:[%s5597_s8 + $0x8] sm:$0xc] }
  0x50   : > { %v512_v1 = vrot.slane %v510_v46, 1  ;;  %v4390_v26 = vcombine.low %v2219_v62, %v5609_v10  ;;  %v2242_v46 = vrot.slane %v5699_v37, 2 }
  0x51   : > { %4917 = vmatmul.mubr.msk.bf16.gmra.mrb[24].mxu0 %vm526_vm1, %v1903_v13  ;;  %v1934_v13 = vrot.slane %v1932_v32, 1 }
  0x52   : > { %4920 = vmatprep.mubr.msk.bf16.mxu0 %vm526_vm1, %v1912_v38  ;;  %v513_v21 = vsel %vm365_vm0, %v508_v9, %v512_v1  ;;  %v2229_v33 = vrot.slane %v4390_v26, 2  ;;  %v2230_v38 = vrot.slane %v5616_v15, 2  ;;  %v2234_v15 = vrot.slane %v5636_v31, 2  ;;  %v5920_v31 = vld [vmem:[%s6613_s1 + $0x70] sm:$0xff]  }
  0x53   : > { %v1938_v4 = vor.u32 %v1937_v20, %v1934_v13  ;;  %v2245_v37 = vsel %vm2228_vm3, %v2242_v46, %v2244_v47  ;;  %v2545_v20 = vld [vmem:[%s5597_s8 + $0x10] sm:$0xc]  ;;  %v5994_v26 = vld [vmem:[%s5597_s8 + $0x14] sm:$0xf] }
  0x54   : > { %v2231_v10 = vsel %vm2228_vm3, %v2229_v33, %v2230_v38  ;;  %v2235_v39 = vsel %vm2228_vm3, %v2232_v5, %v2234_v15  ;;  %v5509_v33 = vld [vmem:[%s5597_s8 + $0x8] sm:$0xff]  }
  0x55   : > { %v1939_v19 = vsel %vm1769_vm2, %v1929_v58, %v1938_v4  ;;  %v2252_v58 = vrot.slane %v5763_v49, 2  ;;  %v2256_v49 = vrot.slane %v5792_v34, 2  ;;  %v2260_v34 = vrot.slane %v5823_v23, 2 }
  0x56   : > { %4761 = vmatmul.mubr.msk.bf16.gmra.mrb[28].mxu1 %vm526_vm1, %v497_v6 }
  0x57   : > { %4764 = vmatprep.mubr.msk.bf16.mxu1 %vm526_vm1, %v505_v56  ;;  %v2248_v56 = vrot.slane %v5737_v18, 2  ;;  %v2254_v18 = vrot.slane %v5772_v3, 2  ;;  %v2253_v35 = vsel %vm2228_vm3, %v2250_v54, %v2252_v58  ;;  %v2258_v3 = vrot.slane %v5800_v51, 2  ;;  %v5508_v51 = vld [vmem:[%s5597_s8 + $0x4] sm:$0xf] }
  0x58   : > { %v2263_v23 = vsel %vm2228_vm3, %v2260_v34, %v2262_v53  ;;  %v996_v53 = vrot.slane %v5510_v43, 1 }
  0x59   : > { %4921 = vmatmul.mubr.msk.bf16.gmra.mrb[28].mxu0 %vm526_vm1, %v1921_v12  ;;  %v2251_v41 = vsel %vm2228_vm3, %v2248_v56, %v2250_v54  ;;  %v2255_v62 = vsel %vm2228_vm3, %v2252_v58, %v2254_v18  ;;  %v2257_v9 = vsel %vm2228_vm3, %v2254_v18, %v2256_v49  ;;  %v2259_v1 = vsel %vm2228_vm3, %v2256_v49, %v2258_v3  ;;  %v983_v12 = vld [vmem:[%s5597_s8] sm:$0xe]  ;;  %v6074_v18 = vld [vmem:[%s5597_s8 + $0x48] sm:$0xff]  }
  0x5a   : > { %4924 = vmatprep.mubr.msk.bf16.mxu0 %vm526_vm1, %v1930_v17  ;;  %v4297_v13 = vcombine.low %v983_v12, %v5508_v51  ;;  %v6623_v17 = vld [vmem:[#allocation3_spill] sm:$0xff]  ;;  %v1008_v49 = vrot.slane %v5704_v42, 1 }
  0x5c   : > { %v993_v4 = vrot.slane %v4297_v13, 1 }
  0x5e   : > { %4765 = vmatmul.mubr.msk.bf16.gmra.mrb[32].mxu1 %vm526_vm1, %v513_v21  ;;  %v2261_v21 = vsel %vm2228_vm3, %v2258_v3, %v2260_v34  ;;  %v6093_v34 = vld [vmem:[%s5597_s8 + $0x58] sm:$0xff]  }
  0x5f   : > { %4772 = vmatprep.mubr.msk.bf16.mxu1 %vm526_vm1, %v5601_v7  ;;  %v2233_v7 = vsel %vm2228_vm3, %v2230_v38, %v2232_v5  ;;  %v994_v38 = vrot.slane %v5509_v33, 1  ;;  %v1014_v33 = vrot.slane %v5742_v28, 1 }
  0x61   : > { %4925 = vmatmul.mubr.msk.bf16.gmra.mrb[32].mxu0 %vm526_vm1, %v1939_v19  ;;  %v6004_v19 = vcombine.low %v2545_v20, %v5994_v26  ;;  %v995_v5 = vsel %vm992_vm4, %v993_v4, %v994_v38  ;;  %v2697_v20 = vrot.slane %v6093_v34, 2  ;;  %v6106_v4 = vld [vmem:[%s5597_s8 + $0x60] sm:$0xff]  }
  0x62   : > { %4932 = vmatprep.mubr.msk.bf16.mxu0 %vm526_vm1, %v2231_v10  ;;  %v6007_v10 = vld [vmem:[%s5597_s8 + $0x18] sm:$0xff]  }
  0x66   : > { %4773 = vmatmul.mubr.msk.bf16.vlgmr.msra.gmra.mrb[0].mxu1 %vm526_vm1, %v5604_v8  ;;  %v2236_v8 = vrot.slane %v5649_v45, 2 }
  0x67   : > { %4776 = vmatprep.mubr.msk.bf16.mxu1 %vm526_vm1, %v5619_v16  ;;  %4809 = vmatpush3.bf16.msra.mxu1 %v5851_v59  ;;  %v2238_v16 = vrot.slane %v5661_v55, 2  ;;  %v5927_v59 = vld [vmem:[%s6613_s1 + $0x30] sm:$0xff]  }
  0x68   : > { %4810 = vmatprep.subr.bf16.mxu1 %v5476_v36  ;;  %v2237_v45 = vsel %vm2228_vm3, %v2234_v15, %v2236_v8  ;;  %v2681_v15 = vrot.slane %v6007_v10, 2 }
  0x69   : > { %4933 = vmatmul.mubr.msk.bf16.vlgmr.msra.gmra.mrb[0].mxu0 %vm526_vm1, %v2233_v7  ;;  %v2239_v55 = vsel %vm2228_vm3, %v2236_v8, %v2238_v16  ;;  %v6019_v7 = vld [vmem:[%s5597_s8 + $0x20] sm:$0xff]   ;;  %v6024_v8 = vld [vmem:[%s5597_s8 + $0x28] sm:$0xff]  }
  0x6a   : > { %4969 = vmatpush3.bf16.msra.mxu0 %v5842_v22  ;;  %4936 = vmatprep.mubr.msk.bf16.mxu0 %vm526_vm1, %v2235_v39  ;;  %v2240_v22 = vrot.slane %v5681_v14, 2  ;;  %v2246_v14 = vrot.slane %v5724_v0, 2 }
  0x6b   : > { %4811 = vmatpush3.bf16.msra.mxu1 %v5476_v36  ;;  %4970 = vmatprep.subr.bf16.mxu0 %v5474_v25  ;;  %v2680_v36 = vrot.slane %v6004_v19, 2 }
  0x6c   : > { %4848 = vmatprep.subr.bf16.mxu1 %v5927_v59  ;;  %v2241_v6 = vsel %vm2228_vm3, %v2238_v16, %v2240_v22  ;;  %v2243_v32 = vsel %vm2228_vm3, %v2240_v22, %v2242_v46  ;;  %v2247_v52 = vsel %vm2228_vm3, %v2244_v47, %v2246_v14  ;;  %v2249_v0 = vsel %vm2228_vm3, %v2246_v14, %v2248_v56  ;;  %v6047_v14 = vld [vmem:[%s5597_s8 + $0x38] sm:$0xff]   ;;  %v6062_v56 = vld [vmem:[%s6613_s1 + $0x80] sm:$0xff]  }
  0x6d   : > { %v2682_v39 = vsel %vm2228_vm3, %v2680_v36, %v2681_v15  ;;  %v997_v16 = vsel %vm992_vm4, %v994_v38, %v996_v53  ;;  %v2685_v22 = vrot.slane %v6024_v8, 2 }
  0x6e   : > { %4777 = vmatmul.mubr.msk.bf16.gmra.mrb[4].mxu1 %vm526_vm1, %v5633_v30  ;;  %4971 = vmatpush3.bf16.msra.mxu0 %v5474_v25  ;;  %v998_v25 = vrot.slane %v5633_v30, 1  ;;  %v5500_v30 = vld [vmem:[%s6613_s1 + $0x38] sm:$0xff]  }
  0x6f   : > { %4780 = vmatprep.mubr.msk.bf16.mxu1 %vm526_vm1, %v5646_v44  ;;  %5008 = vmatprep.subr.bf16.mxu0 %v5920_v31 }
  0x71   : > { %4937 = vmatmul.mubr.msk.bf16.gmra.mrb[4].mxu0 %vm526_vm1, %v2237_v45  ;;  %v2683_v45 = vrot.slane %v6019_v7, 2 }
  0x72   : > { %4940 = vmatprep.mubr.msk.bf16.mxu0 %vm526_vm1, %v2239_v55  ;;  %v999_v55 = vsel %vm992_vm4, %v996_v53, %v998_v25  ;;  %v6124_v53 = vld [vmem:[%s5597_s8 + $0x70] sm:$0xff]  }
  0x73   : > { %v2684_v46 = vsel %vm2228_vm3, %v2681_v15, %v2683_v45  ;;  %v2686_v47 = vsel %vm2228_vm3, %v2683_v45, %v2685_v22 }
  0x76   : > { %4781 = vmatmul.mubr.msk.bf16.gmra.mrb[8].mxu1 %vm526_vm1, %v5655_v50 }
  0x77   : > { %4784 = vmatprep.mubr.msk.bf16.mxu1 %vm526_vm1, %v5669_v61 }
  0x79   : > { %4941 = vmatmul.mubr.msk.bf16.gmra.mrb[8].mxu0 %vm526_vm1, %v2241_v6  ;;  %v6042_v6 = vld [vmem:[%s5597_s8 + $0x30] sm:$0xff]  }
  0x7a   : > { %4944 = vmatprep.mubr.msk.bf16.mxu0 %vm526_vm1, %v2243_v32  ;;  %v1002_v32 = vrot.slane %v5655_v50, 1  ;;  %v2687_v50 = vrot.slane %v6042_v6, 2 }
  0x7c   : > { %v2688_v54 = vsel %vm2228_vm3, %v2685_v22, %v2687_v50 }
  0x7e   : > { %4785 = vmatmul.mubr.msk.bf16.gmra.mrb[12].mxu1 %vm526_vm1, %v5690_v27 }
  0x7f   : > { %4788 = vmatprep.mubr.msk.bf16.mxu1 %vm526_vm1, %v5704_v42 }
  0x81   : > { %4945 = vmatmul.mubr.msk.bf16.gmra.mrb[12].mxu0 %vm526_vm1, %v2245_v37  ;;  %v5490_v37 = vld [vmem:[%s6613_s1 + $0x78] sm:$0xff]  }
  0x82   : > { %4948 = vmatprep.mubr.msk.bf16.mxu0 %vm526_vm1, %v2247_v52  ;;  %v2689_v52 = vrot.slane %v6047_v14, 2 }
  0x84   : > { %v2690_v58 = vsel %vm2228_vm3, %v2687_v50, %v2689_v52 }
  0x86   : > { %4789 = vmatmul.mubr.msk.bf16.gmra.mrb[16].mxu1 %vm526_vm1, %v5715_v57 }
  0x87   : > { %4792 = vmatprep.mubr.msk.bf16.mxu1 %vm526_vm1, %v5732_v11 }
  0x89   : > { %4949 = vmatmul.mubr.msk.bf16.gmra.mrb[16].mxu0 %vm526_vm1, %v2249_v0  ;;  %v6069_v0 = vld [vmem:[%s5597_s8 + $0x40] sm:$0xff]  }
  0x8a   : > { %4952 = vmatprep.mubr.msk.bf16.mxu0 %vm526_vm1, %v2251_v41  ;;  %v1006_v41 = vrot.slane %v5690_v27, 1  ;;  %v2693_v27 = vrot.slane %v6074_v18, 2 }
  0x8c   : > { %v1009_v51 = vsel %vm992_vm4, %v1006_v41, %v1008_v49 }
  0x8e   : > { %4793 = vmatmul.mubr.msk.bf16.gmra.mrb[20].mxu1 %vm526_vm1, %v5742_v28  ;;  %v1016_v28 = vrot.slane %v5760_v48, 1 }
  0x8f   : > { %4796 = vmatprep.mubr.msk.bf16.mxu1 %vm526_vm1, %v5760_v48  ;;  %v2703_v48 = vrot.slane %v6124_v53, 2 }
  0x90   : > { %v1017_v45 = vsel %vm992_vm4, %v1014_v33, %v1016_v28 }
  0x91   : > { %4953 = vmatmul.mubr.msk.bf16.gmra.mrb[20].mxu0 %vm526_vm1, %v2253_v35 }
  0x92   : > { %4956 = vmatprep.mubr.msk.bf16.mxu0 %vm526_vm1, %v2255_v62 }
  0x96   : > { %4797 = vmatmul.mubr.msk.bf16.gmra.mrb[24].mxu1 %vm526_vm1, %v5768_v60 }
  0x97   : > { %4800 = vmatprep.mubr.msk.bf16.mxu1 %vm526_vm1, %v5788_v29 }
  0x99   : > { %4957 = vmatmul.mubr.msk.bf16.gmra.mrb[24].mxu0 %vm526_vm1, %v2257_v9  ;;  %v6088_v9 = vld [vmem:[%s5597_s8 + $0x50] sm:$0xff]  }
  0x9a   : > { %4960 = vmatprep.mubr.msk.bf16.mxu0 %vm526_vm1, %v2259_v1  ;;  %v1010_v1 = vrot.slane %v5715_v57, 1  ;;  %v2695_v42 = vrot.slane %v6088_v9, 2  ;;  %v1012_v57 = vrot.slane %v5732_v11, 1  ;;  %v2699_v11 = vrot.slane %v6106_v4, 2 }
  0x9c   : > { %v1011_v13 = vsel %vm992_vm4, %v1008_v49, %v1010_v1  ;;  %v2698_v38 = vsel %vm2228_vm3, %v2695_v42, %v2697_v20  ;;  %v1015_v36 = vsel %vm992_vm4, %v1012_v57, %v1014_v33  ;;  %v2700_v43 = vsel %vm2228_vm3, %v2697_v20, %v2699_v11  ;;  %v5511_v20 = vld [vmem:[%s5597_s8 + $0x10] sm:$0xff]  }
  0x9d   : > { %v3018_v49 = vshll.u32 %v6007_v10, 16 }
  0x9e   : > { %4801 = vmatmul.mubr.msk.bf16.gmra.mrb[28].mxu1 %vm526_vm1, %v5796_v40 }
  0x9f   : > { %4804 = vmatprep.mubr.msk.bf16.mxu1 %vm526_vm1, %v6623_v17 }
  0xa1   : > { %4961 = vmatmul.mubr.msk.bf16.gmra.mrb[28].mxu0 %vm526_vm1, %v2261_v21  ;;  %v2696_v21 = vsel %vm2228_vm3, %v2693_v27, %v2695_v42  ;;  %v6624_v42 = vld [vmem:[#allocation2_spill] sm:$0xff] }
  0xa2   : > { %4964 = vmatprep.mubr.msk.bf16.mxu0 %vm526_vm1, %v2263_v23  ;;  %v6111_v23 = vld [vmem:[%s5597_s8 + $0x68] sm:$0xff]  }
  0xa3   : > { %v2701_v15 = vrot.slane %v6111_v23, 2 }
  0xa5   : > { %v2704_v22 = vsel %vm2228_vm3, %v2701_v15, %v2703_v48 }
  0xa6   : > { %4805 = vmatmul.mubr.msk.bf16.gmra.mrb[32].mxu1 %vm526_vm1, %v5826_v24 }
  0xa7   : > { %4812 = vmatprep.mubr.msk.bf16.mxu1 %vm526_vm1, %v995_v5  ;;  %v1013_v5 = vsel %vm992_vm4, %v1010_v1, %v1012_v57  ;;  %v1445_v57 = vrot.slane %v5511_v20, 1 }
  0xa9   : > { %4965 = vmatmul.mubr.msk.bf16.gmra.mrb[32].mxu0 %vm526_vm1, %v5880_v63  ;;  %v1000_v63 = vrot.slane %v5646_v44, 1 }
  0xaa   : > { %4972 = vmatprep.mubr.msk.bf16.mxu0 %vm526_vm1, %v2682_v39  ;;  %v2702_v39 = vsel %vm2228_vm3, %v2699_v11, %v2701_v15  ;;  %v3027_v15 = vshll.u32 %v6019_v7, 16 }
  0xab   : > { %v1001_v44 = vsel %vm992_vm4, %v998_v25, %v1000_v63  ;;  %v1018_v25 = vrot.slane %v5768_v60, 1  ;;  %v1020_v60 = vrot.slane %v5788_v29, 1 }
  0xae   : > { %4813 = vmatmul.mubr.msk.bf16.vlgmr.msra.gmra.mrb[0].mxu1 %vm526_vm1, %v997_v16  ;;  %v6129_v16 = vld [vmem:[%s5597_s8 + $0x78] sm:$0xff]  }
  0xaf   : > { %4816 = vmatprep.mubr.msk.bf16.mxu1 %vm526_vm1, %v999_v55  ;;  %4849 = vmatpush3.bf16.msra.mxu1 %v5927_v59  ;;  %v1003_v59 = vsel %vm992_vm4, %v1000_v63, %v1002_v32  ;;  %v1019_v55 = vsel %vm992_vm4, %v1016_v28, %v1018_v25  ;;  %v6142_v63 = vld [vmem:[%s5597_s8 + $0x80] sm:$0xff]  }
  0xb0   : > { %4850 = vmatprep.subr.bf16.mxu1 %v5500_v30  ;;  %v2707_v29 = vrot.slane %v6142_v63, 2 }
  0xb1   : > { %4973 = vmatmul.mubr.msk.bf16.vlgmr.msra.gmra.mrb[0].mxu0 %vm526_vm1, %v2684_v46  ;;  %v1022_v46 = vrot.slane %v5796_v40, 1  ;;  %v1024_v40 = vrot.slane %v6623_v17, 1 }
  0xb2   : > { %5009 = vmatpush3.bf16.msra.mxu0 %v5920_v31  ;;  %4976 = vmatprep.mubr.msk.bf16.mxu0 %vm526_vm1, %v2686_v47  ;;  %v1004_v31 = vrot.slane %v5669_v61, 1  ;;  %v2691_v61 = vrot.slane %v6069_v0, 2  ;;  %v6147_v47 = vld [vmem:[%s5597_s8 + $0x88] sm:$0xff]  }
  0xb3   : > { %4851 = vmatpush3.bf16.msra.mxu1 %v5500_v30  ;;  %5010 = vmatprep.subr.bf16.mxu0 %v5490_v37  ;;  %v2705_v30 = vrot.slane %v6129_v16, 2  ;;  %v2709_v50 = vrot.slane %v6147_v47, 2 }
  0xb4   : > { %v1005_v35 = vsel %vm992_vm4, %v1002_v32, %v1004_v31  ;;  %v1007_v62 = vsel %vm992_vm4, %v1004_v31, %v1006_v41  ;;  %v2692_v3 = vsel %vm2228_vm3, %v2689_v52, %v2691_v61  ;;  %v2694_v12 = vsel %vm2228_vm3, %v2691_v61, %v2693_v27  ;;  %v6160_v52 = vld [vmem:[%s5597_s8 + $0x90] sm:$0xff]  }
  0xb5   : > { %v2706_v32 = vsel %vm2228_vm3, %v2703_v48, %v2705_v30  ;;  %v1026_v31 = vrot.slane %v5826_v24, 1  ;;  %v2710_v41 = vsel %vm2228_vm3, %v2707_v29, %v2709_v50  ;;  %v2711_v17 = vrot.slane %v6160_v52, 2 }
  0xb6   : > { %4817 = vmatmul.mubr.msk.bf16.gmra.mrb[4].mxu1 %vm526_vm1, %v1001_v44  ;;  %5011 = vmatpush3.bf16.msra.mxu0 %v5490_v37  ;;  %v1021_v37 = vsel %vm992_vm4, %v1018_v25, %v1020_v60  ;;  %v1023_v44 = vsel %vm992_vm4, %v1020_v60, %v1022_v46  ;;  %v3007_v24 = vshrl.u32 %v6004_v19, 16  ;;  %v3015_v27 = vshrl.u32 %v6007_v10, 16 }
  0xb7   : > { %4820 = vmatprep.mubr.msk.bf16.mxu1 %vm526_vm1, %v1003_v59  ;;  %5048 = vmatprep.subr.bf16.mxu0 %v6062_v56  ;;  %v2708_v59 = vsel %vm2228_vm3, %v2705_v30, %v2707_v29  ;;  %v2712_v1 = vsel %vm2228_vm3, %v2709_v50, %v2711_v17  ;;  %v3033_v25 = vshrl.u32 %v6024_v8, 16  ;;  %v3029_v60 = vrot.slane %v3027_v15, 3 }
  0xb8   : > { %v3017_v33 = vrot.slane %v3015_v27, 2 }
  0xb9   : > { %4977 = vmatmul.mubr.msk.bf16.gmra.mrb[4].mxu0 %vm526_vm1, %v2688_v54  ;;  %v6164_v54 = vld [vmem:[%s5597_s8 + $0x98] sm:$0xff]  }
  0xba   : > { %4980 = vmatprep.mubr.msk.bf16.mxu0 %vm526_vm1, %v2690_v58  ;;  %v1025_v58 = vsel %vm992_vm4, %v1022_v46, %v1024_v40  ;;  %v2713_v61 = vrot.slane %v6164_v54, 2 }
  0xbe   : > { %4821 = vmatmul.mubr.msk.bf16.gmra.mrb[8].mxu1 %vm526_vm1, %v1005_v35  ;;  %v1027_v35 = vsel %vm992_vm4, %v1024_v40, %v1026_v31 }
  0xbf   : > { %4824 = vmatprep.mubr.msk.bf16.mxu1 %vm526_vm1, %v1007_v62  ;;  %v3010_v62 = vshll.u32 %v6004_v19, 16  ;;  %v3009_v19 = vrot.slane %v3007_v24, 2 }
  0xc1   : > { %4981 = vmatmul.mubr.msk.bf16.gmra.mrb[8].mxu0 %vm526_vm1, %v2692_v3  ;;  %v1028_v3 = vrot.slane %v5857_v2, 1 }
  0xc2   : > { %4984 = vmatprep.mubr.msk.bf16.mxu0 %vm526_vm1, %v2694_v12  ;;  %v2714_v12 = vsel %vm2228_vm3, %v2711_v17, %v2713_v61  ;;  %v3054_v17 = vshll.u32 %v6047_v14, 16 }
  0xc6   : > { %4825 = vmatmul.mubr.msk.bf16.gmra.mrb[12].mxu1 %vm526_vm1, %v1009_v51  ;;  %v5499_v51 = vld [vmem:[%s5597_s8 + $0xa0] ss:$0 sps:$4 sm:$0x33]  }
  0xc7   : > { %4828 = vmatprep.mubr.msk.bf16.mxu1 %vm526_vm1, %v1011_v13  ;;  %v1444_v13 = vrot.slane %v6624_v42, 1  ;;  %v2715_v2 = vrot.slane %v5499_v51, 2  ;;  %v3056_v51 = vrot.slane %v3054_v17, 3  ;;  %v5502_v42 = vld [vmem:[%s6613_s1 + $0x88] sm:$0xff]  }
  0xc9   : > { %4985 = vmatmul.mubr.msk.bf16.gmra.mrb[12].mxu0 %vm526_vm1, %v2696_v21  ;;  %v3012_v21 = vrot.slane %v3010_v62, 3  ;;  %v1446_v11 = vsel %vm992_vm4, %v1444_v13, %v1445_v57 }
  0xca   : > { %4988 = vmatprep.mubr.msk.bf16.mxu0 %vm526_vm1, %v2698_v38  ;;  %v3020_v38 = vrot.slane %v3018_v49, 3  ;;  %v5515_v49 = vld [vmem:[%s5597_s8 + $0x30] sm:$0xff]  }
  0xcb   : > { %v3013_v28 = vor.u32 %v3012_v21, %v3009_v19  ;;  %v3060_v19 = vshrl.u32 %v6069_v0, 16  ;;  %v3063_v21 = vshll.u32 %v6069_v0, 16 }
  0xcd   : > { %v3065_v15 = vrot.slane %v3063_v21, 3 }
  0xce   : > { %4829 = vmatmul.mubr.msk.bf16.gmra.mrb[16].mxu1 %vm526_vm1, %v1013_v5  ;;  %v1029_v5 = vsel %vm992_vm4, %v1026_v31, %v1028_v3  ;;  %v3045_v31 = vshll.u32 %v6042_v6, 16  ;;  %v1453_v3 = vrot.slane %v5515_v49, 1  ;;  %v3099_v49 = vshll.u32 %v6106_v4, 16 }
  0xcf   : > { %4832 = vmatprep.mubr.msk.bf16.mxu1 %vm526_vm1, %v1015_v36  ;;  %v3024_v36 = vshrl.u32 %v6019_v7, 16 }
  0xd0   : > { %v3047_v27 = vrot.slane %v3045_v31, 3  ;;  %v5519_v31 = vld [vmem:[%s5597_s8 + $0x50] sm:$0xff]  }
  0xd1   : > { %4989 = vmatmul.mubr.msk.bf16.gmra.mrb[16].mxu0 %vm526_vm1, %v2700_v43  ;;  %v3021_v43 = vor.u32 %v3020_v38, %v3017_v33  ;;  %v3026_v30 = vrot.slane %v3024_v36, 2  ;;  %v3069_v38 = vshrl.u32 %v6074_v18, 16  ;;  %v3062_v36 = vrot.slane %v3060_v19, 2  ;;  %v5521_v19 = vld [vmem:[%s5597_s8 + $0x60] sm:$0xff]  }
  0xd2   : > { %4992 = vmatprep.mubr.msk.bf16.mxu0 %vm526_vm1, %v2702_v39  ;;  %v3036_v39 = vshll.u32 %v6024_v8, 16  ;;  %v1465_v21 = vrot.slane %v5521_v19, 1 }
  0xd3   : > { %v3030_v50 = vor.u32 %v3029_v60, %v3026_v30  ;;  %v3078_v60 = vshrl.u32 %v6088_v9, 16 }
  0xd4   : > { %v3038_v29 = vrot.slane %v3036_v39, 3  ;;  %v3071_v39 = vrot.slane %v3069_v38, 2 }
  0xd5   : > { %v3031_v24 = vsel %vm3005_vm5, %v3021_v43, %v3030_v50 }
  0xd6   : > { %4833 = vmatmul.mubr.msk.bf16.gmra.mrb[20].mxu1 %vm526_vm1, %v1017_v45  ;;  %v5512_v45 = vld [vmem:[%s5597_s8 + $0x18] sm:$0xff]  }
  0xd7   : > { %4836 = vmatprep.mubr.msk.bf16.mxu1 %vm526_vm1, %v1019_v55  ;;  %v1447_v48 = vrot.slane %v5512_v45, 1  ;;  %v2716_v55 = vsel %vm2228_vm3, %v2713_v61, %v2715_v2 }
  0xd9   : > { %4993 = vmatmul.mubr.msk.bf16.gmra.mrb[20].mxu0 %vm526_vm1, %v2704_v22  ;;  %v5513_v22 = vld [vmem:[%s5597_s8 + $0x20] sm:$0xff]  }
  0xda   : > { %4996 = vmatprep.mubr.msk.bf16.mxu0 %vm526_vm1, %v2706_v32  ;;  %v1449_v46 = vrot.slane %v5513_v22, 1  ;;  %v3022_v32 = vsel %vm3005_vm5, %v3013_v28, %v3021_v43  ;;  %v5517_v28 = vld [vmem:[%s5597_s8 + $0x40] sm:$0xff]   ;;  %v3081_v22 = vshll.u32 %v6088_v9, 16 }
  0xdb   : > { %v1457_v43 = vrot.slane %v5517_v28, 1 }
  0xdc   : > { %v1450_v40 = vsel %vm992_vm4, %v1447_v48, %v1449_v46 }
  0xde   : > { %4837 = vmatmul.mubr.msk.bf16.gmra.mrb[24].mxu1 %vm526_vm1, %v1021_v37  ;;  %v3035_v37 = vrot.slane %v3033_v25, 2 }
  0xdf   : > { %4840 = vmatprep.mubr.msk.bf16.mxu1 %vm526_vm1, %v1023_v44  ;;  %v1448_v44 = vsel %vm992_vm4, %v1445_v57, %v1447_v48 }
  0xe1   : > { %4997 = vmatmul.mubr.msk.bf16.gmra.mrb[24].mxu0 %vm526_vm1, %v2708_v59  ;;  %v3042_v59 = vshrl.u32 %v6042_v6, 16 }
  0xe2   : > { %5000 = vmatprep.mubr.msk.bf16.mxu0 %vm526_vm1, %v2710_v41  ;;  %v3039_v41 = vor.u32 %v3038_v29, %v3035_v37  ;;  %v3090_v37 = vshll.u32 %v6093_v34, 16  ;;  %v5518_v29 = vld [vmem:[%s5597_s8 + $0x48] sm:$0xff]  }
  0xe3   : > { %v3044_v62 = vrot.slane %v3042_v59, 2  ;;  %v3083_v59 = vrot.slane %v3081_v22, 3 }
  0xe5   : > { %v3048_v20 = vor.u32 %v3047_v27, %v3044_v62  ;;  %v3096_v27 = vshrl.u32 %v6106_v4, 16 }
  0xe6   : > { %4841 = vmatmul.mubr.msk.bf16.gmra.mrb[28].mxu1 %vm526_vm1, %v1025_v58  ;;  %v3051_v58 = vshrl.u32 %v6047_v14, 16 }
  0xe7   : > { %4844 = vmatprep.mubr.msk.bf16.mxu1 %vm526_vm1, %v1027_v35  ;;  %v5514_v35 = vld [vmem:[%s5597_s8 + $0x28] sm:$0xff]  }
  0xe8   : > { %v1451_v61 = vrot.slane %v5514_v35, 1  ;;  %v3092_v35 = vrot.slane %v3090_v37, 3 }
  0xe9   : > { %5001 = vmatmul.mubr.msk.bf16.gmra.mrb[28].mxu0 %vm526_vm1, %v2712_v1  ;;  %v3040_v1 = vsel %vm3005_vm5, %v3030_v50, %v3039_v41 }
  0xea   : > { %5004 = vmatprep.mubr.msk.bf16.mxu0 %vm526_vm1, %v2714_v12  ;;  %v3053_v12 = vrot.slane %v3051_v58, 2  ;;  %v1452_v13 = vsel %vm992_vm4, %v1449_v46, %v1451_v61  ;;  %v1454_v57 = vsel %vm992_vm4, %v1451_v61, %v1453_v3 }
  0xec   : > { %v3057_v33 = vor.u32 %v3056_v51, %v3053_v12  ;;  %v3108_v12 = vshll.u32 %v6111_v23, 16  ;;  %v5520_v51 = vld [vmem:[%s5597_s8 + $0x58] sm:$0xff]  }
  0xee   : > { %4845 = vmatmul.mubr.msk.bf16.gmra.mrb[32].mxu1 %vm526_vm1, %v1029_v5  ;;  %v3072_v5 = vshll.u32 %v6074_v18, 16  ;;  %v3058_v25 = vsel %vm3005_vm5, %v3048_v20, %v3057_v33 }
  0xef   : > { %4852 = vmatprep.mubr.msk.bf16.mxu1 %vm526_vm1, %v1446_v11  ;;  %v3049_v11 = vsel %vm3005_vm5, %v3039_v41, %v3048_v20  ;;  %v1461_v41 = vrot.slane %v5519_v31, 1  ;;  %v3098_v20 = vrot.slane %v3096_v27, 2  ;;  %v5525_v27 = vld [vmem:[%s5597_s8 + $0x80] sm:$0xff]  }
  0xf0   : > { %v3074_v45 = vrot.slane %v3072_v5, 3  ;;  %v3110_v5 = vrot.slane %v3108_v12, 3 }
  0xf1   : > { %5005 = vmatmul.mubr.msk.bf16.gmra.mrb[32].mxu0 %vm526_vm1, %v2716_v55  ;;  %v3066_v55 = vor.u32 %v3065_v15, %v3062_v36  ;;  %v3114_v36 = vshrl.u32 %v6124_v53, 16  ;;  %v3117_v15 = vshll.u32 %v6124_v53, 16 }
  0xf2   : > { %5012 = vmatprep.mubr.msk.bf16.mxu0 %vm526_vm1, %v3022_v32  ;;  %v3075_v46 = vor.u32 %v3074_v45, %v3071_v39  ;;  %v3087_v32 = vshrl.u32 %v6093_v34, 16  ;;  %v5522_v39 = vld [vmem:[%s5597_s8 + $0x68] sm:$0xff]  }
  0xf3   : > { %v3067_v50 = vsel %vm3005_vm5, %v3057_v33, %v3066_v55  ;;  %v1467_v45 = vrot.slane %v5522_v39, 1 }
  0xf4   : > { %v3076_v58 = vsel %vm3005_vm5, %v3066_v55, %v3075_v46  ;;  %v3089_v17 = vrot.slane %v3087_v32, 2  ;;  %v3116_v55 = vrot.slane %v3114_v36, 2  ;;  %v5527_v36 = vld [vmem:[%s5597_s8 + $0x90] sm:$0xff]  }
  0xf6   : > { %4853 = vmatmul.mubr.msk.bf16.vlgmr.msra.gmra.mrb[0].mxu1 %vm526_vm1, %v1448_v44  ;;  %v1459_v44 = vrot.slane %v5518_v29, 1  ;;  %v1468_v29 = vsel %vm992_vm4, %v1465_v21, %v1467_v45 }
  0xf7   : > { %4856 = vmatprep.mubr.msk.bf16.mxu1 %vm526_vm1, %v1450_v40  ;;  %v3080_v40 = vrot.slane %v3078_v60, 2  ;;  %v5523_v60 = vld [vmem:[%s5597_s8 + $0x70] sm:$0xff]  }
  0xf8   : > { %v1460_v61 = vsel %vm992_vm4, %v1457_v43, %v1459_v44  ;;  %v1462_v62 = vsel %vm992_vm4, %v1459_v44, %v1461_v41  ;;  %v1469_v22 = vrot.slane %v5523_v60, 1 }
  0xf9   : > { %5013 = vmatmul.mubr.msk.bf16.vlgmr.msra.gmra.mrb[0].mxu0 %vm526_vm1, %v3031_v24  ;;  %v3084_v24 = vor.u32 %v3083_v59, %v3080_v40  ;;  %v3132_v40 = vshrl.u32 %v6142_v63, 16  ;;  %v3135_v59 = vshll.u32 %v6142_v63, 16 }
  0xfa   : > { %5049 = vmatpush3.bf16.msra.mxu0 %v6062_v56  ;;  %5016 = vmatprep.mubr.msk.bf16.mxu0 %vm526_vm1, %v3040_v1  ;;  %v5516_v56 = vld [vmem:[%s5597_s8 + $0x38] sm:$0xff]   ;;  %v3105_v1 = vshrl.u32 %v6111_v23, 16 }
  0xfb   : > { %5050 = vmatprep.subr.bf16.mxu0 %v5502_v42  ;;  %v1455_v2 = vrot.slane %v5516_v56, 1 }
  0xfc   : > { %v3107_v38 = vrot.slane %v3105_v1, 2 }
  0xfd   : > { %v1456_v48 = vsel %vm992_vm4, %v1453_v3, %v1455_v2  ;;  %v1458_v30 = vsel %vm992_vm4, %v1455_v2, %v1457_v43  ;;  %v3093_v3 = vor.u32 %v3092_v35, %v3089_v17  ;;  %v3123_v43 = vshrl.u32 %v6129_v16, 16  ;;  %v5524_v17 = vld [vmem:[%s5597_s8 + $0x78] sm:$0xff]  }
  0xfe   : > { %4857 = vmatmul.mubr.msk.bf16.gmra.mrb[4].mxu1 %vm526_vm1, %v1452_v13  ;;  %5051 = vmatpush3.bf16.msra.mxu0 %v5502_v42  ;;  %v1463_v42 = vrot.slane %v5520_v51, 1  ;;  %v3085_v13 = vsel %vm3005_vm5, %v3075_v46, %v3084_v24  ;;  %v3111_v28 = vor.u32 %v3110_v5, %v3107_v38  ;;  %v1471_v35 = vrot.slane %v5524_v17, 1  ;;  %v5526_v38 = vld [vmem:[%s5597_s8 + $0x88] sm:$0xff]  }
  0xff   : > { %4860 = vmatprep.mubr.msk.bf16.mxu1 %vm526_vm1, %v1454_v57  ;;  %v3101_v57 = vrot.slane %v3099_v49, 3  ;;  %v3094_v33 = vsel %vm3005_vm5, %v3084_v24, %v3093_v3  ;;  %v3125_v32 = vrot.slane %v3123_v43, 2  ;;  %v3134_v24 = vrot.slane %v3132_v40, 2 }
 0x100   : > { %v1464_v56 = vsel %vm992_vm4, %v1461_v41, %v1463_v42  ;;  %v3141_v41 = vshrl.u32 %v6147_v47, 16  ;;  %v1473_v49 = vrot.slane %v5525_v27, 1  ;;  %v1472_v51 = vsel %vm992_vm4, %v1469_v22, %v1471_v35 }
 0x101   : > { %5017 = vmatmul.mubr.msk.bf16.gmra.mrb[4].mxu0 %vm526_vm1, %v3049_v11  ;;  %v3102_v2 = vor.u32 %v3101_v57, %v3098_v20  ;;  %v1466_v11 = vsel %vm992_vm4, %v1463_v42, %v1465_v21  ;;  %v3150_v20 = vshrl.u32 %v6160_v52, 16  ;;  %v3153_v57 = vshll.u32 %v6160_v52, 16 }
 0x102   : > { %5020 = vmatprep.mubr.msk.bf16.mxu0 %vm526_vm1, %v3058_v25  ;;  %v3126_v25 = vshll.u32 %v6129_v16, 16  ;;  %v3143_v1 = vrot.slane %v3141_v41, 2  ;;  %v3159_v21 = vshrl.u32 %v6164_v54, 16  ;;  %v1475_v5 = vrot.slane %v5526_v38, 1 }
 0x103   : > { %v3112_v46 = vsel %vm3005_vm5, %v3102_v2, %v3111_v28  ;;  %v3466_v17 = vrot.slane %v6007_v10, 3  ;;  %v3472_v10 = vrot.slane %v6042_v6, 3  ;;  %v3480_v6 = vrot.slane %v6088_v9, 3 }
 0x104   : > { %v3128_v37 = vrot.slane %v3126_v25, 3  ;;  %v3161_v25 = vrot.slane %v3159_v21, 2  ;;  %v3486_v9 = vrot.slane %v6111_v23, 3  ;;  %v3494_v23 = vrot.slane %v6147_v47, 3 }
 0x106   : > { %4861 = vmatmul.mubr.msk.bf16.gmra.mrb[8].mxu1 %vm526_vm1, %v1456_v48  ;;  %v3103_v48 = vsel %vm3005_vm5, %v3093_v3, %v3102_v2  ;;  %v3129_v31 = vor.u32 %v3128_v37, %v3125_v32  ;;  %v3152_v2 = vrot.slane %v3150_v20, 2  ;;  %v3455_v32 = vld [vmem:[%s5597_s8 + $0x10] sm:$0x8] }
 0x107   : > { %4864 = vmatprep.mubr.msk.bf16.mxu1 %vm526_vm1, %v1458_v30  ;;  %v3119_v30 = vrot.slane %v3117_v15, 3  ;;  %v1477_v15 = vrot.slane %v5527_v36, 1 }
 0x109   : > { %5021 = vmatmul.mubr.msk.bf16.gmra.mrb[8].mxu0 %vm526_vm1, %v3067_v50  ;;  %v3120_v44 = vor.u32 %v3119_v30, %v3116_v55  ;;  %v1470_v50 = vsel %vm992_vm4, %v1467_v45, %v1469_v22  ;;  %v1476_v45 = vsel %vm992_vm4, %v1473_v49, %v1475_v5  ;;  %v1478_v30 = vsel %vm992_vm4, %v1475_v5, %v1477_v15 }
 0x10a   : > { %5024 = vmatprep.mubr.msk.bf16.mxu0 %vm526_vm1, %v3076_v58  ;;  %v3144_v58 = vshll.u32 %v6147_v47, 16 }
 0x10b   : > { %v3130_v3 = vsel %vm3005_vm5, %v3120_v44, %v3129_v31 }
 0x10c   : > { %v3146_v12 = vrot.slane %v3144_v58, 3 }
 0x10e   : > { %4865 = vmatmul.mubr.msk.bf16.gmra.mrb[12].mxu1 %vm526_vm1, %v1460_v61  ;;  %v3121_v61 = vsel %vm3005_vm5, %v3111_v28, %v3120_v44  ;;  %v3147_v19 = vor.u32 %v3146_v12, %v3143_v1  ;;  %v6301_v28 = vld [vmem:[%s5597_s8 + $0xa0] ss:$0 sps:$4 sm:$0x77]  }
 0x10f   : > { %4868 = vmatprep.mubr.msk.bf16.mxu1 %vm526_vm1, %v1462_v62  ;;  %v3137_v62 = vrot.slane %v3135_v59, 3  ;;  %v3168_v60 = vshrl.u32 %v6301_v28, 16  ;;  %v3171_v22 = vshll.u32 %v6301_v28, 16  ;;  %v4483_v59 = vcombine.low %v3455_v32, %v5994_v26 }
 0x110   : > { %v3468_v26 = vrot.slane %v6019_v7, 3  ;;  %v3476_v7 = vrot.slane %v6069_v0, 3  ;;  %v3500_v47 = vrot.slane %v6301_v28, 3 }
 0x111   : > { %5025 = vmatmul.mubr.msk.bf16.gmra.mrb[12].mxu0 %vm526_vm1, %v3085_v13  ;;  %v3138_v42 = vor.u32 %v3137_v62, %v3134_v24  ;;  %v1474_v13 = vsel %vm992_vm4, %v1471_v35, %v1473_v49  ;;  %v3170_v44 = vrot.slane %v3168_v60, 2  ;;  %v3465_v58 = vrot.slane %v4483_v59, 3 }
 0x112   : > { %5028 = vmatprep.mubr.msk.bf16.mxu0 %vm526_vm1, %v3094_v33  ;;  %v3162_v33 = vshll.u32 %v6164_v54, 16  ;;  %v3470_v24 = vrot.slane %v6024_v8, 3  ;;  %v3469_v62 = vsel %vm3464_vm6, %v3466_v17, %v3468_v26  ;;  %v3474_v49 = vrot.slane %v6047_v14, 3  ;;  %v5506_v14 = vld [vmem:[%s6615_s3] sm:$0xff]  }
 0x113   : > { %v3148_v43 = vsel %vm3005_vm5, %v3138_v42, %v3147_v19  ;;  %v3478_v8 = vrot.slane %v6074_v18, 3  ;;  %5088 = vmatprep.subr.bf16.mxu1 %v5506_v14 }
 0x114   : > { %v3164_v39 = vrot.slane %v3162_v33, 3  ;;  %v3471_v27 = vsel %vm3464_vm6, %v3468_v26, %v3470_v24  ;;  %v3475_v1 = vsel %vm3464_vm6, %v3472_v10, %v3474_v49  ;;  %v3477_v12 = vsel %vm3464_vm6, %v3474_v49, %v3476_v7  ;;  %5089 = vmatpush3.bf16.msra.mxu1 %v5506_v14 }
 0x115   : > { %v3481_v0 = vsel %vm3464_vm6, %v3478_v8, %v3480_v6 }
 0x116   : > { %4869 = vmatmul.mubr.msk.bf16.gmra.mrb[16].mxu1 %vm526_vm1, %v1464_v56  ;;  %v3139_v56 = vsel %vm3005_vm5, %v3129_v31, %v3138_v42  ;;  %v3482_v42 = vrot.slane %v6093_v34, 3  ;;  %v3488_v34 = vrot.slane %v6124_v53, 3  ;;  %v3496_v53 = vrot.slane %v6160_v52, 3 }
 0x117   : > { %4872 = vmatprep.mubr.msk.bf16.mxu1 %vm526_vm1, %v1466_v11  ;;  %v3155_v11 = vrot.slane %v3153_v57, 3 }
 0x118   : > { %v3483_v18 = vsel %vm3464_vm6, %v3480_v6, %v3482_v42  ;;  %v3489_v21 = vsel %vm3464_vm6, %v3486_v9, %v3488_v34 }
 0x119   : > { %5029 = vmatmul.mubr.msk.bf16.gmra.mrb[16].mxu0 %vm526_vm1, %v3103_v48  ;;  %v5503_v48 = vld [vmem:[%s5597_s8 + $0x98] ss:$0 sps:$4 sm:$0x11]   ;;  %v3156_v55 = vor.u32 %v3155_v11, %v3152_v2 }
 0x11a   : > { %5032 = vmatprep.mubr.msk.bf16.mxu0 %vm526_vm1, %v3112_v46  ;;  %v3165_v46 = vor.u32 %v3164_v39, %v3161_v25  ;;  %v1479_v37 = vrot.slane %v5503_v48, 1 }
 0x11c   : > { %v3166_v40 = vsel %vm3005_vm5, %v3156_v55, %v3165_v46  ;;  %v1480_v31 = vsel %vm992_vm4, %v1477_v15, %v1479_v37 }
 0x11e   : > { %4873 = vmatmul.mubr.msk.bf16.gmra.mrb[20].mxu1 %vm526_vm1, %v1468_v29  ;;  %v3157_v29 = vsel %vm3005_vm5, %v3147_v19, %v3156_v55  ;;  %v3490_v19 = vrot.slane %v6129_v16, 3  ;;  %v3498_v16 = vrot.slane %v6164_v54, 3 }
 0x11f   : > { %4876 = vmatprep.mubr.msk.bf16.mxu1 %vm526_vm1, %v1470_v50  ;;  %v3173_v50 = vrot.slane %v3171_v22, 3 }
 0x120   : > { %v3491_v33 = vsel %vm3464_vm6, %v3488_v34, %v3490_v19  ;;  %v3499_v2 = vsel %vm3464_vm6, %v3496_v53, %v3498_v16  ;;  %v3501_v52 = vsel %vm3464_vm6, %v3498_v16, %v3500_v47 }
 0x121   : > { %5033 = vmatmul.mubr.msk.bf16.gmra.mrb[20].mxu0 %vm526_vm1, %v3121_v61  ;;  %v3174_v41 = vor.u32 %v3173_v50, %v3170_v44  ;;  %v3467_v61 = vsel %vm3464_vm6, %v3465_v58, %v3466_v17 }
 0x122   : > { %5036 = vmatprep.mubr.msk.bf16.mxu0 %vm526_vm1, %v3130_v3  ;;  %v3473_v3 = vsel %vm3464_vm6, %v3470_v24, %v3472_v10 }
 0x123   : > { %v3175_v35 = vsel %vm3005_vm5, %v3165_v46, %v3174_v41 }
 0x126   : > { %4877 = vmatmul.mubr.msk.bf16.gmra.mrb[24].mxu1 %vm526_vm1, %v1472_v51  ;;  %v3479_v51 = vsel %vm3464_vm6, %v3476_v7, %v3478_v8  ;;  %v6442_v8 = vld [vmem:[%s6614_s2] ss:$0 sm:$0xff] }
 0x127   : > { %4880 = vmatprep.mubr.msk.bf16.mxu1 %vm526_vm1, %v1474_v13  ;;  %v3484_v13 = vrot.slane %v6106_v4, 3  ;;  %v3492_v4 = vrot.slane %v6142_v63, 3  ;;  %v5507_v63 = vld [vmem:[%s6615_s3 + $0x8] sm:$0xff]  }
 0x128   : > { %5090 = vmatprep.subr.bf16.mxu1 %v5507_v63 }
 0x129   : > { %5037 = vmatmul.mubr.msk.bf16.gmra.mrb[24].mxu0 %vm526_vm1, %v3139_v56  ;;  %v3485_v20 = vsel %vm3464_vm6, %v3482_v42, %v3484_v13  ;;  %v3487_v57 = vsel %vm3464_vm6, %v3484_v13, %v3486_v9  ;;  %v3493_v38 = vsel %vm3464_vm6, %v3490_v19, %v3492_v4  ;;  %v3495_v5 = vsel %vm3464_vm6, %v3492_v4, %v3494_v23 }
 0x12a   : > { %5040 = vmatprep.mubr.msk.bf16.mxu0 %vm526_vm1, %v3148_v43  ;;  %v3497_v56 = vsel %vm3464_vm6, %v3494_v23, %v3496_v53  ;;  %5091 = vmatpush3.bf16.msra.mxu1 %v5507_v63 }
 0x12e   : > { %4881 = vmatmul.mubr.msk.bf16.gmra.mrb[28].mxu1 %vm526_vm1, %v1476_v45 }
 0x12f   : > { %4884 = vmatprep.mubr.msk.bf16.mxu1 %vm526_vm1, %v1478_v30 }
 0x131   : > { %5041 = vmatmul.mubr.msk.bf16.gmra.mrb[28].mxu0 %vm526_vm1, %v3157_v29 }
 0x132   : > { %5044 = vmatprep.mubr.msk.bf16.mxu0 %vm526_vm1, %v3166_v40 }
 0x136   : > { %4885 = vmatmul.mubr.msk.bf16.gmra.mrb[32].mxu1 %vm526_vm1, %v1480_v31 }
 0x139   : > { %5045 = vmatmul.mubr.msk.bf16.gmra.mrb[32].mxu0 %vm526_vm1, %v3175_v35 }
 0x13a   : > { %5052 = vmatprep.mubr.msk.bf16.mxu0 %vm526_vm1, %v3467_v61 }
 0x141   : > { %5053 = vmatmul.mubr.msk.bf16.vlgmr.msra.gmra.mrb[0].mxu0 %vm526_vm1, %v3469_v62 }
 0x142   : > { %5056 = vmatprep.mubr.msk.bf16.mxu0 %vm526_vm1, %v3471_v27 }
 0x149   : > { %5057 = vmatmul.mubr.msk.bf16.gmra.mrb[4].mxu0 %vm526_vm1, %v3473_v3 }
 0x14a   : > { %5060 = vmatprep.mubr.msk.bf16.mxu0 %vm526_vm1, %v3475_v1 }
 0x151   : > { %5061 = vmatmul.mubr.msk.bf16.gmra.mrb[8].mxu0 %vm526_vm1, %v3477_v12 }
 0x152   : > { %5064 = vmatprep.mubr.msk.bf16.mxu0 %vm526_vm1, %v3479_v51 }
 0x159   : > { %5065 = vmatmul.mubr.msk.bf16.gmra.mrb[12].mxu0 %vm526_vm1, %v3481_v0 }
 0x15a   : > { %5068 = vmatprep.mubr.msk.bf16.mxu0 %vm526_vm1, %v3483_v18 }
 0x161   : > { %5069 = vmatmul.mubr.msk.bf16.gmra.mrb[16].mxu0 %vm526_vm1, %v3485_v20 }
 0x162   : > { %5072 = vmatprep.mubr.msk.bf16.mxu0 %vm526_vm1, %v3487_v57 }
 0x169   : > { %5073 = vmatmul.mubr.msk.bf16.gmra.mrb[20].mxu0 %vm526_vm1, %v3489_v21 }
 0x16a   : > { %5076 = vmatprep.mubr.msk.bf16.mxu0 %vm526_vm1, %v3491_v33 }
 0x171   : > { %5077 = vmatmul.mubr.msk.bf16.gmra.mrb[24].mxu0 %vm526_vm1, %v3493_v38 }
 0x172   : > { %5080 = vmatprep.mubr.msk.bf16.mxu0 %vm526_vm1, %v3495_v5 }
 0x179   : > { %5081 = vmatmul.mubr.msk.bf16.gmra.mrb[28].mxu0 %vm526_vm1, %v3497_v56 }
 0x17a   : > { %5084 = vmatprep.mubr.msk.bf16.mxu0 %vm526_vm1, %v3499_v2 }
 0x181   : > { %5085 = vmatmul.mubr.msk.bf16.gmra.mrb[32].mxu0 %vm526_vm1, %v3501_v52 }
 0x1c9   : > { %v4854_v54 = vpop.f32.mrb[0].mxu1 }
 0x1ca   : > { %v1581_v11 = vpop.f32.mrb[1].mxu1 }
 0x1cb   : > { %v4855_v36 = vpop.f32.mrb[2].mxu1 }
 0x1cc   : > { %v1584_v15 = vpop.f32.mrb[3].mxu1 }
 0x1d1   : > { %v4858_v43 = vpop.f32.mrb[4].mxu1 }
 0x1d2   : > { %v1597_v25 = vpop.f32.mrb[5].mxu1 }
 0x1d3   : > { %v4859_v39 = vpop.f32.mrb[6].mxu1 }
 0x1d4   : > { %v1600_v45 = vpop.f32.mrb[7].mxu1 }
 0x1d9   : > { %v6383_v48 = vpop.f32.mrb[8].mxu1 }
 0x1da   : > { %v6385_v55 = vpop.f32.mrb[9].mxu1 }
 0x1db   : > { %v6387_v30 = vpop.f32.mrb[10].mxu1 }
 0x1dc   : > { %v6389_v28 = vpop.f32.mrb[11].mxu1 }
 0x1e1   : > { %v6391_v60 = vpop.f32.mrb[12].mxu1 }
 0x1e2   : > { %v6393_v22 = vpop.f32.mrb[13].mxu1 }
 0x1e3   : > { %v6395_v46 = vpop.f32.mrb[14].mxu1 }
 0x1e4   : > { %v6397_v32 = vpop.f32.mrb[15].mxu1 }
 0x1e9   : > { %v6399_v37 = vpop.f32.mrb[16].mxu1 }
 0x1ea   : > { %v6401_v29 = vpop.f32.mrb[17].mxu1 }
 0x1eb   : > { %v6403_v44 = vpop.f32.mrb[18].mxu1 }
 0x1ec   : > { %v6405_v50 = vpop.f32.mrb[19].mxu1 }
 0x1f1   : > { %v6407_v40 = vpop.f32.mrb[20].mxu1 }
 0x1f2   : > { %v6409_v59 = vpop.f32.mrb[21].mxu1 }
 0x1f3   : > { %v6411_v31 = vpop.f32.mrb[22].mxu1 }
 0x1f4   : > { %v6413_v41 = vpop.f32.mrb[23].mxu1 }
 0x1f9   : > { %v6415_v58 = vpop.f32.mrb[24].mxu1 }
 0x1fa   : > { %v6417_v17 = vpop.f32.mrb[25].mxu1 }
 0x1fb   : > { %v6419_v35 = vpop.f32.mrb[26].mxu1 }
 0x1fc   : > { %v6421_v61 = vpop.f32.mrb[27].mxu1 }
 0x201   : > { %v6423_v26 = vpop.f32.mrb[28].mxu1 }
 0x202   : > { %v6425_v24 = vpop.f32.mrb[29].mxu1 }
 0x203   : > { %v6427_v62 = vpop.f32.mrb[30].mxu1 }
 0x204   : > { %v6429_v27 = vpop.f32.mrb[31].mxu1 }
 0x209   : > { %v6431_v10 = vpop.f32.mrb[32].mxu1 }
 0x20a   : > { %v6433_v49 = vpop.f32.mrb[33].mxu1 }
 0x20b   : > { %v6435_v3 = vpop.f32.mrb[34].mxu1 }
 0x20c   : > { %v6437_v1 = vpop.f32.mrb[35].mxu1 }
 0x214   : > { %v5054_v7 = vpop.f32.mrb[0].mxu0 }
 0x215   : > { %v5128_v12 = vadd.f32 %v5054_v7, %v4854_v54  ;;  %v3602_v51 = vpop.f32.mrb[1].mxu0 }
 0x216   : > { %v5129_v6 = vadd.f32 %v3602_v51, %v1581_v11  ;;  %v5055_v14 = vpop.f32.mrb[2].mxu0 }
 0x217   : > { %v3790_v42 = vadd.f32 %v5128_v12, %v6442_v8  ;;  %v5130_v0 = vadd.f32 %v5055_v14, %v4855_v36  ;;  %v3605_v18 = vpop.f32.mrb[3].mxu0 }
 0x218   : > { %v3788_v13 = vadd.f32 %v5129_v6, %v6442_v8  ;;  %v5131_v9 = vadd.f32 %v3605_v18, %v1584_v15 }
 0x219   : > { %v3791_v20 = vadd.f32 %v5130_v0, %v6442_v8  ;;  %v3826_v34 = vmax.f32 %v3790_v42, 0.0 }
 0x21a   : > { %v3789_v57 = vadd.f32 %v5131_v9, %v6442_v8  ;;  %v3824_v21 = vmax.f32 %v3788_v13, 0.0 }
 0x21b   : > { %v3827_v19 = vmax.f32 %v3791_v20, 0.0 }
 0x21c   : > { %v3825_v33 = vmax.f32 %v3789_v57, 0.0  ;;  %v5058_v4 = vpop.f32.mrb[4].mxu0 }
 0x21d   : > { %v3861_v23 = vpack.c.bf16 %v3827_v19, %v3826_v34  ;;  %v5132_v38 = vadd.f32 %v5058_v4, %v4858_v43  ;;  %v3618_v5 = vpop.f32.mrb[5].mxu0 }
 0x21e   : > { %v3860_v53 = vpack.c.bf16 %v3825_v33, %v3824_v21  ;;  %v5133_v16 = vadd.f32 %v3618_v5, %v1597_v25  ;;  %v5059_v56 = vpop.f32.mrb[6].mxu0 }
 0x21f   : > { %v3794_v2 = vadd.f32 %v5132_v38, %v6442_v8  ;;  %v5134_v63 = vadd.f32 %v5059_v56, %v4859_v39  ;;  %v3621_v47 = vpop.f32.mrb[7].mxu0 }
 0x220   : > { %v3792_v52 = vadd.f32 %v5133_v16, %v6442_v8  ;;  %v5135_v54 = vadd.f32 %v3621_v47, %v1600_v45  ;;  %5092 = vmatprep.mubr.msk.bf16.mxu1 %vm526_vm1, %v3860_v53 }
 0x221   : > { %v3795_v11 = vadd.f32 %v5134_v63, %v6442_v8  ;;  %5093 = vmatmul.mubr.msk.bf16.vlgmr.msra.gmra.mrb[36].mxu1 %vm526_vm1, %v3861_v23  ;;  %v3830_v15 = vmax.f32 %v3794_v2, 0.0 }
 0x222   : > { %v3793_v36 = vadd.f32 %v5135_v54, %v6442_v8  ;;  %v3828_v7 = vmax.f32 %v3792_v52, 0.0 }
 0x223   : > { %v3831_v43 = vmax.f32 %v3795_v11, 0.0 }
 0x224   : > { %v3829_v25 = vmax.f32 %v3793_v36, 0.0  ;;  %v5062_v12 = vpop.f32.mrb[8].mxu0 }
 0x225   : > { %v3863_v51 = vpack.c.bf16 %v3831_v43, %v3830_v15  ;;  %v5136_v39 = vadd.f32 %v5062_v12, %v6383_v48  ;;  %v3634_v6 = vpop.f32.mrb[9].mxu0 }
 0x226   : > { %v3862_v14 = vpack.c.bf16 %v3829_v25, %v3828_v7  ;;  %v5137_v45 = vadd.f32 %v3634_v6, %v6385_v55  ;;  %v5063_v42 = vpop.f32.mrb[10].mxu0 }
 0x227   : > { %v3798_v0 = vadd.f32 %v5136_v39, %v6442_v8  ;;  %v5138_v18 = vadd.f32 %v5063_v42, %v6387_v30  ;;  %v3637_v13 = vpop.f32.mrb[11].mxu0 }
 0x228   : > { %v3796_v9 = vadd.f32 %v5137_v45, %v6442_v8  ;;  %v5139_v20 = vadd.f32 %v3637_v13, %v6389_v28  ;;  %5096 = vmatprep.mubr.msk.bf16.mxu1 %vm526_vm1, %v3862_v14 }
 0x229   : > { %v3799_v57 = vadd.f32 %v5138_v18, %v6442_v8  ;;  %5097 = vmatmul.mubr.msk.bf16.gmra.mrb[40].mxu1 %vm526_vm1, %v3863_v51  ;;  %v3834_v34 = vmax.f32 %v3798_v0, 0.0 }
 0x22a   : > { %v3797_v48 = vadd.f32 %v5139_v20, %v6442_v8  ;;  %v3832_v19 = vmax.f32 %v3796_v9, 0.0 }
 0x22b   : > { %v3835_v55 = vmax.f32 %v3799_v57, 0.0 }
 0x22c   : > { %v3833_v21 = vmax.f32 %v3797_v48, 0.0  ;;  %v5066_v33 = vpop.f32.mrb[12].mxu0 }
 0x22d   : > { %v3865_v4 = vpack.c.bf16 %v3835_v55, %v3834_v34  ;;  %v5140_v30 = vadd.f32 %v5066_v33, %v6391_v60  ;;  %v3650_v23 = vpop.f32.mrb[13].mxu0 }
 0x22e   : > { %v3864_v38 = vpack.c.bf16 %v3833_v21, %v3832_v19  ;;  %v5141_v28 = vadd.f32 %v3650_v23, %v6393_v22  ;;  %v5067_v5 = vpop.f32.mrb[14].mxu0 }
 0x22f   : > { %v3802_v53 = vadd.f32 %v5140_v30, %v6442_v8  ;;  %v5142_v16 = vadd.f32 %v5067_v5, %v6395_v46  ;;  %v3653_v56 = vpop.f32.mrb[15].mxu0 }
 0x230   : > { %v3800_v2 = vadd.f32 %v5141_v28, %v6442_v8  ;;  %v5143_v63 = vadd.f32 %v3653_v56, %v6397_v32  ;;  %5100 = vmatprep.mubr.msk.bf16.mxu1 %vm526_vm1, %v3864_v38 }
 0x231   : > { %v3803_v47 = vadd.f32 %v5142_v16, %v6442_v8  ;;  %5101 = vmatmul.mubr.msk.bf16.gmra.mrb[44].mxu1 %vm526_vm1, %v3865_v4  ;;  %v3838_v52 = vmax.f32 %v3802_v53, 0.0 }
 0x232   : > { %v3801_v60 = vadd.f32 %v5143_v63, %v6442_v8  ;;  %v3836_v54 = vmax.f32 %v3800_v2, 0.0 }
 0x233   : > { %v3839_v22 = vmax.f32 %v3803_v47, 0.0 }
 0x234   : > { %v3837_v11 = vmax.f32 %v3801_v60, 0.0  ;;  %v5070_v36 = vpop.f32.mrb[16].mxu0 }
 0x235   : > { %v3867_v15 = vpack.c.bf16 %v3839_v22, %v3838_v52  ;;  %v5144_v46 = vadd.f32 %v5070_v36, %v6399_v37  ;;  %v3666_v43 = vpop.f32.mrb[17].mxu0 }
 0x236   : > { %v3866_v7 = vpack.c.bf16 %v3837_v11, %v3836_v54  ;;  %v5145_v32 = vadd.f32 %v3666_v43, %v6401_v29  ;;  %v5071_v25 = vpop.f32.mrb[18].mxu0 }
 0x237   : > { %v3806_v12 = vadd.f32 %v5144_v46, %v6442_v8  ;;  %v5146_v51 = vadd.f32 %v5071_v25, %v6403_v44  ;;  %v3669_v39 = vpop.f32.mrb[19].mxu0 }
 0x238   : > { %v3804_v6 = vadd.f32 %v5145_v32, %v6442_v8  ;;  %v5147_v14 = vadd.f32 %v3669_v39, %v6405_v50  ;;  %5104 = vmatprep.mubr.msk.bf16.mxu1 %vm526_vm1, %v3866_v7 }
 0x239   : > { %v3807_v45 = vadd.f32 %v5146_v51, %v6442_v8  ;;  %5105 = vmatmul.mubr.msk.bf16.gmra.mrb[48].mxu1 %vm526_vm1, %v3867_v15  ;;  %v3842_v42 = vmax.f32 %v3806_v12, 0.0 }
 0x23a   : > { %v3805_v37 = vadd.f32 %v5147_v14, %v6442_v8  ;;  %v3840_v0 = vmax.f32 %v3804_v6, 0.0 }
 0x23b   : > { %v3843_v29 = vmax.f32 %v3807_v45, 0.0 }
 0x23c   : > { %v3841_v18 = vmax.f32 %v3805_v37, 0.0  ;;  %v5074_v13 = vpop.f32.mrb[20].mxu0 }
 0x23d   : > { %v3869_v9 = vpack.c.bf16 %v3843_v29, %v3842_v42  ;;  %v5148_v44 = vadd.f32 %v5074_v13, %v6407_v40  ;;  %v3682_v20 = vpop.f32.mrb[21].mxu0 }
 0x23e   : > { %v3868_v57 = vpack.c.bf16 %v3841_v18, %v3840_v0  ;;  %v5149_v50 = vadd.f32 %v3682_v20, %v6409_v59  ;;  %v5075_v48 = vpop.f32.mrb[22].mxu0 }
 0x23f   : > { %v3810_v34 = vadd.f32 %v5148_v44, %v6442_v8  ;;  %v5150_v55 = vadd.f32 %v5075_v48, %v6411_v31  ;;  %v3685_v19 = vpop.f32.mrb[23].mxu0 }
 0x240   : > { %v3808_v21 = vadd.f32 %v5149_v50, %v6442_v8  ;;  %v5151_v33 = vadd.f32 %v3685_v19, %v6413_v41  ;;  %5108 = vmatprep.mubr.msk.bf16.mxu1 %vm526_vm1, %v3868_v57 }
 0x241   : > { %v3811_v4 = vadd.f32 %v5150_v55, %v6442_v8  ;;  %5109 = vmatmul.mubr.msk.bf16.gmra.mrb[52].mxu1 %vm526_vm1, %v3869_v9  ;;  %v3846_v30 = vmax.f32 %v3810_v34, 0.0 }
 0x242   : > { %v3809_v40 = vadd.f32 %v5151_v33, %v6442_v8  ;;  %v3844_v23 = vmax.f32 %v3808_v21, 0.0 }
 0x243   : > { %v3847_v59 = vmax.f32 %v3811_v4, 0.0 }
 0x244   : > { %v3845_v38 = vmax.f32 %v3809_v40, 0.0  ;;  %v5078_v28 = vpop.f32.mrb[24].mxu0 }
 0x245   : > { %v3871_v5 = vpack.c.bf16 %v3847_v59, %v3846_v30  ;;  %v5152_v31 = vadd.f32 %v5078_v28, %v6415_v58  ;;  %v3698_v53 = vpop.f32.mrb[25].mxu0 }
 0x246   : > { %v3870_v16 = vpack.c.bf16 %v3845_v38, %v3844_v23  ;;  %v5153_v41 = vadd.f32 %v3698_v53, %v6417_v17  ;;  %v5079_v56 = vpop.f32.mrb[26].mxu0 }
 0x247   : > { %v3814_v2 = vadd.f32 %v5152_v31, %v6442_v8  ;;  %v5154_v63 = vadd.f32 %v5079_v56, %v6419_v35  ;;  %v3701_v47 = vpop.f32.mrb[27].mxu0 }
 0x248   : > { %v3812_v60 = vadd.f32 %v5153_v41, %v6442_v8  ;;  %v5155_v52 = vadd.f32 %v3701_v47, %v6421_v61  ;;  %5112 = vmatprep.mubr.msk.bf16.mxu1 %vm526_vm1, %v3870_v16 }
 0x249   : > { %v3815_v22 = vadd.f32 %v5154_v63, %v6442_v8  ;;  %5113 = vmatmul.mubr.msk.bf16.gmra.mrb[56].mxu1 %vm526_vm1, %v3871_v5  ;;  %v3850_v54 = vmax.f32 %v3814_v2, 0.0 }
 0x24a   : > { %v3813_v58 = vadd.f32 %v5155_v52, %v6442_v8  ;;  %v3848_v11 = vmax.f32 %v3812_v60, 0.0 }
 0x24b   : > { %v3851_v17 = vmax.f32 %v3815_v22, 0.0 }
 0x24c   : > { %v3849_v36 = vmax.f32 %v3813_v58, 0.0  ;;  %v5082_v15 = vpop.f32.mrb[28].mxu0 }
 0x24d   : > { %v3873_v46 = vpack.c.bf16 %v3851_v17, %v3850_v54  ;;  %v5156_v35 = vadd.f32 %v5082_v15, %v6423_v26  ;;  %v3714_v43 = vpop.f32.mrb[29].mxu0 }
 0x24e   : > { %v3872_v7 = vpack.c.bf16 %v3849_v36, %v3848_v11  ;;  %v5157_v61 = vadd.f32 %v3714_v43, %v6425_v24  ;;  %v5083_v32 = vpop.f32.mrb[30].mxu0 }
 0x24f   : > { %v3818_v25 = vadd.f32 %v5156_v35, %v6442_v8  ;;  %v5158_v12 = vadd.f32 %v5083_v32, %v6427_v62  ;;  %v3717_v51 = vpop.f32.mrb[31].mxu0 }
 0x250   : > { %v3816_v39 = vadd.f32 %v5157_v61, %v6442_v8  ;;  %v5159_v6 = vadd.f32 %v3717_v51, %v6429_v27  ;;  %5116 = vmatprep.mubr.msk.bf16.mxu1 %vm526_vm1, %v3872_v7 }
 0x251   : > { %v3819_v14 = vadd.f32 %v5158_v12, %v6442_v8  ;;  %5117 = vmatmul.mubr.msk.bf16.gmra.mrb[60].mxu1 %vm526_vm1, %v3873_v46  ;;  %v3854_v45 = vmax.f32 %v3818_v25, 0.0 }
 0x252   : > { %v3817_v26 = vadd.f32 %v5159_v6, %v6442_v8  ;;  %v3852_v37 = vmax.f32 %v3816_v39, 0.0 }
 0x253   : > { %v3855_v24 = vmax.f32 %v3819_v14, 0.0 }
 0x254   : > { %v3853_v42 = vmax.f32 %v3817_v26, 0.0  ;;  %v5086_v29 = vpop.f32.mrb[32].mxu0 }
 0x255   : > { %v3875_v0 = vpack.c.bf16 %v3855_v24, %v3854_v45  ;;  %v5160_v62 = vadd.f32 %v5086_v29, %v6431_v10  ;;  %v3730_v18 = vpop.f32.mrb[33].mxu0 }
 0x256   : > { %v3874_v13 = vpack.c.bf16 %v3853_v42, %v3852_v37  ;;  %v5161_v27 = vadd.f32 %v3730_v18, %v6433_v49  ;;  %v5087_v9 = vpop.f32.mrb[34].mxu0 }
 0x257   : > { %v3822_v44 = vadd.f32 %v5160_v62, %v6442_v8  ;;  %v5162_v20 = vadd.f32 %v5087_v9, %v6435_v3  ;;  %v3733_v57 = vpop.f32.mrb[35].mxu0 }
 0x258   : > { %v3820_v50 = vadd.f32 %v5161_v27, %v6442_v8  ;;  %v5163_v48 = vadd.f32 %v3733_v57, %v6437_v1  ;;  %5120 = vmatprep.mubr.msk.bf16.mxu1 %vm526_vm1, %v3874_v13  ;;  %v6530_v1 = vld [vmem:[%s6616_s4] ss:$0 sm:$0xff] }
 0x259   : > { %v3823_v34 = vadd.f32 %v5162_v20, %v6442_v8  ;;  %5121 = vmatmul.mubr.msk.bf16.gmra.mrb[64].mxu1 %vm526_vm1, %v3875_v0  ;;  %v3858_v49 = vmax.f32 %v3822_v44, 0.0 }
 0x25a   : > { %v3821_v10 = vadd.f32 %v5163_v48, %v6442_v8  ;;  %v3856_v19 = vmax.f32 %v3820_v50, 0.0 }
 0x25b   : > { %v3859_v55 = vmax.f32 %v3823_v34, 0.0 }
 0x25c   : > { %v3857_v21 = vmax.f32 %v3821_v10, 0.0 }
 0x25d   : > { %v3877_v33 = vpack.c.bf16 %v3859_v55, %v3858_v49 }
 0x25e   : > { %v3876_v3 = vpack.c.bf16 %v3857_v21, %v3856_v19 }
 0x260   : > { %5124 = vmatprep.mubr.msk.bf16.mxu1 %vm526_vm1, %v3876_v3 }
 0x261   : > { %5125 = vmatmul.mubr.msk.bf16.gmra.mrb[68].mxu1 %vm526_vm1, %v3877_v33 }
 0x2f4   : > { %v5094_v8 = vpop.f32.mrb[36].mxu1 }
 0x2f5   : > { %v3998_v4 = vadd.f32 %v5094_v8, %v6530_v1  ;;  %v3989_v40 = vpop.f32.mrb[37].mxu1 }
 0x2f6   : > { %v3990_v30 = vadd.f32 %v6530_v1, %v3989_v40  ;;  %v5095_v59 = vpop.f32.mrb[38].mxu1 }
 0x2f7   : > { %4134 = vst [vmem:[%s6535_s25 + $0x10] sm:$0xff] %v3998_v4  ;;  %v4001_v23 = vadd.f32 %v5095_v59, %v6530_v1  ;;  %v3992_v38 = vpop.f32.mrb[39].mxu1 }
 0x2f8   : > { %4132 = vst [vmem:[%s6535_s25] sm:$0xff] %v3990_v30  ;;  %v3993_v28 = vadd.f32 %v6530_v1, %v3992_v38 }
 0x2f9   : > { %4135 = vst [vmem:[%s6535_s25 + $0x18] sm:$0xff] %v4001_v23 }
 0x2fa   : > { %4133 = vst [vmem:[%s6535_s25 + $0x8] sm:$0xff] %v3993_v28 }
 0x2fc   : > { %v5098_v5 = vpop.f32.mrb[40].mxu1 }
 0x2fd   : > { %v4014_v31 = vadd.f32 %v5098_v5, %v6530_v1  ;;  %v4005_v53 = vpop.f32.mrb[41].mxu1 }
 0x2fe   : > { %v4006_v16 = vadd.f32 %v6530_v1, %v4005_v53  ;;  %v5099_v41 = vpop.f32.mrb[42].mxu1 }
 0x2ff   : > { %4138 = vst [vmem:[%s6535_s25 + $0x30] sm:$0xff] %v4014_v31  ;;  %v4017_v56 = vadd.f32 %v5099_v41, %v6530_v1  ;;  %v4008_v2 = vpop.f32.mrb[43].mxu1 }
 0x300   : > { %4136 = vst [vmem:[%s6535_s25 + $0x20] sm:$0xff] %v4006_v16  ;;  %v4009_v63 = vadd.f32 %v6530_v1, %v4008_v2 }
 0x301   : > { %4139 = vst [vmem:[%s6535_s25 + $0x38] sm:$0xff] %v4017_v56 }
 0x302   : > { %4137 = vst [vmem:[%s6535_s25 + $0x28] sm:$0xff] %v4009_v63 }
 0x304   : > { %v5102_v47 = vpop.f32.mrb[44].mxu1 }
 0x305   : > { %v4030_v60 = vadd.f32 %v5102_v47, %v6530_v1  ;;  %v4021_v52 = vpop.f32.mrb[45].mxu1 }
 0x306   : > { %v4022_v22 = vadd.f32 %v6530_v1, %v4021_v52  ;;  %v5103_v58 = vpop.f32.mrb[46].mxu1 }
 0x307   : > { %4142 = vst [vmem:[%s6535_s25 + $0x50] sm:$0xff] %v4030_v60  ;;  %v4033_v54 = vadd.f32 %v5103_v58, %v6530_v1  ;;  %v4024_v17 = vpop.f32.mrb[47].mxu1 }
 0x308   : > { %4140 = vst [vmem:[%s6535_s25 + $0x40] sm:$0xff] %v4022_v22  ;;  %v4025_v11 = vadd.f32 %v6530_v1, %v4024_v17 }
 0x309   : > { %4143 = vst [vmem:[%s6535_s25 + $0x58] sm:$0xff] %v4033_v54 }
 0x30a   : > { %4141 = vst [vmem:[%s6535_s25 + $0x48] sm:$0xff] %v4025_v11 }
 0x30c   : > { %v5106_v36 = vpop.f32.mrb[48].mxu1 }
 0x30d   : > { %v4046_v15 = vadd.f32 %v5106_v36, %v6530_v1  ;;  %v4037_v46 = vpop.f32.mrb[49].mxu1 }
 0x30e   : > { %v4038_v35 = vadd.f32 %v6530_v1, %v4037_v46  ;;  %v5107_v43 = vpop.f32.mrb[50].mxu1 }
 0x30f   : > { %4146 = vst [vmem:[%s6535_s25 + $0x70] sm:$0xff] %v4046_v15  ;;  %v4049_v7 = vadd.f32 %v5107_v43, %v6530_v1  ;;  %v4040_v61 = vpop.f32.mrb[51].mxu1 }
 0x310   : > { %4144 = vst [vmem:[%s6535_s25 + $0x60] sm:$0xff] %v4038_v35  ;;  %v4041_v32 = vadd.f32 %v6530_v1, %v4040_v61 }
 0x311   : > { %4147 = vst [vmem:[%s6535_s25 + $0x78] sm:$0xff] %v4049_v7 }
 0x312   : > { %4145 = vst [vmem:[%s6535_s25 + $0x68] sm:$0xff] %v4041_v32 }
 0x314   : > { %v5110_v25 = vpop.f32.mrb[52].mxu1 }
 0x315   : > { %v4062_v12 = vadd.f32 %v5110_v25, %v6530_v1  ;;  %v4053_v51 = vpop.f32.mrb[53].mxu1 }
 0x316   : > { %v4054_v39 = vadd.f32 %v6530_v1, %v4053_v51  ;;  %v5111_v6 = vpop.f32.mrb[54].mxu1 }
 0x317   : > { %4150 = vst [vmem:[%s6535_s25 + $0x90] sm:$0xff] %v4062_v12  ;;  %v4065_v14 = vadd.f32 %v5111_v6, %v6530_v1  ;;  %v4056_v26 = vpop.f32.mrb[55].mxu1 }
 0x318   : > { %4148 = vst [vmem:[%s6535_s25 + $0x80] sm:$0xff] %v4054_v39  ;;  %v4057_v45 = vadd.f32 %v6530_v1, %v4056_v26 }
 0x319   : > { %4151 = vst [vmem:[%s6535_s25 + $0x98] sm:$0xff] %v4065_v14 }
 0x31a   : > { %4149 = vst [vmem:[%s6535_s25 + $0x88] sm:$0xff] %v4057_v45 }
 0x31c   : > { %v5114_v24 = vpop.f32.mrb[56].mxu1 }
 0x31d   : > { %v4078_v37 = vadd.f32 %v5114_v24, %v6530_v1  ;;  %v4069_v42 = vpop.f32.mrb[57].mxu1 }
 0x31e   : > { %v4070_v29 = vadd.f32 %v6530_v1, %v4069_v42  ;;  %v5115_v0 = vpop.f32.mrb[58].mxu1 }
 0x31f   : > { %4154 = vst [vmem:[%s6535_s25 + $0xb0] sm:$0xff] %v4078_v37  ;;  %v4081_v62 = vadd.f32 %v5115_v0, %v6530_v1  ;;  %v4072_v18 = vpop.f32.mrb[59].mxu1 }
 0x320   : > { %4152 = vst [vmem:[%s6535_s25 + $0xa0] sm:$0xff] %v4070_v29  ;;  %v4073_v13 = vadd.f32 %v6530_v1, %v4072_v18 }
 0x321   : > { %4155 = vst [vmem:[%s6535_s25 + $0xb8] sm:$0xff] %v4081_v62 }
 0x322   : > { %4153 = vst [vmem:[%s6535_s25 + $0xa8] sm:$0xff] %v4073_v13 }
 0x324   : > { %v5118_v27 = vpop.f32.mrb[60].mxu1 }
 0x325   : > { %v4094_v9 = vadd.f32 %v5118_v27, %v6530_v1  ;;  %v4085_v44 = vpop.f32.mrb[61].mxu1 }
 0x326   : > { %v4086_v20 = vadd.f32 %v6530_v1, %v4085_v44  ;;  %v5119_v57 = vpop.f32.mrb[62].mxu1 }
 0x327   : > { %4158 = vst [vmem:[%s6535_s25 + $0xd0] sm:$0xff] %v4094_v9  ;;  %v4097_v50 = vadd.f32 %v5119_v57, %v6530_v1  ;;  %v4088_v48 = vpop.f32.mrb[63].mxu1 }
 0x328   : > { %4156 = vst [vmem:[%s6535_s25 + $0xc0] sm:$0xff] %v4086_v20  ;;  %v4089_v34 = vadd.f32 %v6530_v1, %v4088_v48 }
 0x329   : > { %4159 = vst [vmem:[%s6535_s25 + $0xd8] sm:$0xff] %v4097_v50 }
 0x32a   : > { %4157 = vst [vmem:[%s6535_s25 + $0xc8] sm:$0xff] %v4089_v34 }
 0x32c   : > { %v5122_v10 = vpop.f32.mrb[64].mxu1 }
 0x32d   : > { %v4110_v49 = vadd.f32 %v5122_v10, %v6530_v1  ;;  %v4101_v55 = vpop.f32.mrb[65].mxu1 }
 0x32e   : > { %v4102_v19 = vadd.f32 %v6530_v1, %v4101_v55  ;;  %v5123_v21 = vpop.f32.mrb[66].mxu1 }
 0x32f   : > { %4162 = vst [vmem:[%s6535_s25 + $0xf0] sm:$0xff] %v4110_v49  ;;  %v4113_v33 = vadd.f32 %v5123_v21, %v6530_v1  ;;  %v4104_v3 = vpop.f32.mrb[67].mxu1 }
 0x330   : > { %4160 = vst [vmem:[%s6535_s25 + $0xe0] sm:$0xff] %v4102_v19  ;;  %v4105_v8 = vadd.f32 %v6530_v1, %v4104_v3 }
 0x331   : > { %4163 = vst [vmem:[%s6535_s25 + $0xf8] sm:$0xff] %v4113_v33 }
 0x332   : > { %4161 = vst [vmem:[%s6535_s25 + $0xe8] sm:$0xff] %v4105_v8 }
 0x334   : > { %v5126_v4 = vpop.f32.mrb[68].mxu1 }
 0x335   : > { %v4126_v40 = vadd.f32 %v5126_v4, %v6530_v1  ;;  %v4117_v30 = vpop.f32.mrb[69].mxu1 }
 0x336   : > { %v4118_v59 = vadd.f32 %v6530_v1, %v4117_v30  ;;  %v5127_v23 = vpop.f32.mrb[70].mxu1 }
 0x337   : > { %4166 = vst [vmem:[%s6535_s25 + $0x110] sm:$0xff] %v4126_v40  ;;  %v4129_v38 = vadd.f32 %v5127_v23, %v6530_v1  ;;  %v4120_v28 = vpop.f32.mrb[71].mxu1 }
 0x338   : > { %4164 = vst [vmem:[%s6535_s25 + $0x100] sm:$0xff] %v4118_v59  ;;  %v4121_v5 = vadd.f32 %v6530_v1, %v4120_v28 }
 0x339   : > { %4167 = vst [vmem:[%s6535_s25 + $0x118] sm:$0xff] %v4129_v38 }
 0x33a   : > { %4165 = vst [vmem:[%s6535_s25 + $0x108] sm:$0xff] %v4121_v5 }
 0x33b PF: > { %s15_s18 = sadd.s32 1, %s5534_s18  }
 0x33c   : > { %p12_p4 = scmp.ge.s32.totalorder %s15_s18, 4  }
 0x33e   :  { %14 = sbr.rel (!%p12_p4) target bundleno = 1 (0x1), region = 78 }

</bundles_post_ra>
